<compile_context>
chip_gen: v5e
topology: v5e:2x2
jax: 0.10.0
libtpu: 0.0.40
codegen_flags: <defaults>
</compile_context>

<pallas_src>
import jax
import jax.numpy as jnp
from jax import lax
from jax.experimental import pallas as pl
from jax.experimental.pallas import tpu as pltpu


def _round_up(x, k):
    return (x + k - 1) // k * k


def _vmem_capacity_bytes():
    """Physical VMEM per core; conservative fallback if the query is unavailable."""
    try:
        info = pltpu.get_tpu_info()
        cap = getattr(info, "vmem_capacity_bytes", None)
        if cap:
            return int(cap)
    except Exception:
        pass
    return 64 * 1024 * 1024          # v7x per-TensorCore VMEM (smallest generation)


def _choose_tn(m_pad, vmem_cap):
    """n-tile size from a generation-aware VMEM budget.

    The 3-NN phase keeps ~10 live (m_pad, TN) f32-sized temporaries (distance
    tile, iota, masks, one-hot, weight accumulator, ...).  Budget a third of
    physical VMEM for them so v5e/v6e (128 MiB) pick 1-2K tiles while v7x
    (64 MiB) stays safe.
    """
    budget = vmem_cap // 3
    per_col = 10 * 4 * max(int(m_pad), 128)
    tn_max = max(128, budget // per_col)
    for cand in (2048, 1024, 512, 256, 128):
        if cand <= tn_max:
            return cand
    return 128


def _make_fp_kernel(num_layers, fold_first, compute_dtype):
    f32 = jnp.float32
    cd = compute_dtype

    def kernel(*refs):
        refs = list(refs)
        out_ref = refs.pop()                      # (1, CoutL, TN)
        it = iter(refs)
        kpack_ref = next(it)                      # (1, m_pad, 8) f32: [-2x,-2y,-2z,|k|^2,0..]
        upack_ref = next(it)                      # (1, 8, TN)    f32: [x;y;z;1;0..]
        uf_ref = next(it)                         # (1, C1, TN)   cd  (native layout)
        kf_ref = next(it)                         # (1, K, m_pad) cd  (maybe pre-folded)
        w1top_ref = None if fold_first else next(it)   # (Cout1, C2) cd
        w1bot_ref = next(it)                      # (Cout1, C1) cd
        b1_ref = next(it)                         # (Cout1, 1) f32
        rest = [(next(it), next(it)) for _ in range(num_layers - 1)]

        kpack = kpack_ref[0]                      # (m_pad, 8)
        upack = upack_ref[0]                      # (8, TN)

        # ---------- 3-NN search on an (m_pad, TN) distance tile (f32) ----------
        # d0[i, j] = |k_i|^2 - 2 <k_i, u_j>   (the per-query |u_j|^2 is constant
        # along the m axis, so it does not affect the argmin; it is added back
        # only to the (1, TN) selected minima below.)
        d0 = jnp.dot(kpack, upack, preferred_element_type=f32)        # (m_pad, TN)
        u2 = jnp.sum(upack * upack, axis=0, keepdims=True) - 1.0      # (1, TN) = |u|^2

        mrows = d0.shape[0]
        iota = lax.broadcasted_iota(jnp.int32, d0.shape, 0).astype(f32)
        big = jnp.float32(3.0e38)

        dcur = d0
        wnum = None        # unnormalized 3-NN weight matrix accumulator (m_pad, TN)
        norm = None        # sum of reciprocal distances (1, TN)
        for j in range(3):
            mv = jnp.min(dcur, axis=0, keepdims=True)                 # (1, TN)
            ismin = dcur <= mv
            first = jnp.min(jnp.where(ismin, iota, jnp.float32(mrows)),
                            axis=0, keepdims=True)                    # lowest tied index
            oh = iota == first                                        # one-hot (m_pad, TN)
            d2 = jnp.maximum(mv + u2, 0.0)                            # (1, TN)
            recip = 1.0 / (jnp.sqrt(d2) + 1e-8)                       # matches 1/(dist+1e-8)
            contrib = jnp.where(oh, recip, 0.0)
            wnum = contrib if j == 0 else wnum + contrib
            norm = recip if j == 0 else norm + recip
            if j < 2:
                dcur = jnp.where(oh, big, dcur)

        inv_norm = 1.0 / norm                                         # (1, TN)

        # ---------- interpolation (channels-first), normalization folded after ----------
        # interp(K, TN) = kf(K, m_pad) @ wnum(m_pad, TN) * inv_norm  (per-column scaling
        # commutes with the contraction over m, so this is exact).
        t = jnp.dot(kf_ref[0], wnum.astype(cd),
                    preferred_element_type=f32) * inv_norm            # (K, TN) f32

        # ---------- layer 1: concat fused into a split channels-first matmul ----------
        uf = uf_ref[0]                                                # (C1, TN)
        if fold_first:
            z = t                                                     # W1top already folded
        else:
            z = jnp.dot(w1top_ref[...], t.astype(cd),
                        preferred_element_type=f32)                   # (Cout1, TN)
        z = z + jnp.dot(w1bot_ref[...], uf, preferred_element_type=f32)
        x = jnp.maximum(z + b1_ref[...], 0.0)                         # BN scale pre-folded

        # ---------- remaining layers, all channels-first ----------
        for w_ref, b_ref in rest:
            z = jnp.dot(w_ref[...], x.astype(cd), preferred_element_type=f32)
            x = jnp.maximum(z + b_ref[...], 0.0)

        out_ref[0] = x.astype(out_ref.dtype)                          # lane-dense store

    return kernel


def pointnet2_fp_pallas(unknown, known, unknow_feats, known_feats,
                        conv_weights, bn_scales, bn_shifts, *,
                        compute_dtype=jnp.bfloat16, tn=None, fold_first=None):
    """unknown (B,n,3), known (B,m,3), unknow_feats (B,C1,n), known_feats (B,C2,m).

    conv_weights[l]: (Cout_l, Cin_l); bn_scales/bn_shifts[l]: (Cout_l,)
    (eval-mode BN folded to an affine).  compute_dtype: bf16 (default; MXU
    operands bf16, f32 accumulation, distances f32) or f32 (exact).
    Returns (B, mlp[-1], n), matching the PyTorch module.
    """
    B, n, _ = unknown.shape
    m = known.shape[1]
    C1 = unknow_feats.shape[1]
    C2 = known_feats.shape[1]
    num_layers = len(conv_weights)
    assert num_layers >= 1
    assert m >= 3, "3-NN interpolation assumes at least 3 known points"
    assert conv_weights[0].shape[1] == C1 + C2
    cout1 = conv_weights[0].shape[0]
    cout_last = conv_weights[-1].shape[0]

    f32 = jnp.float32
    cd = jnp.dtype(compute_dtype)
    hp = lax.Precision.HIGHEST

    # ---------- generation-aware tiling ----------
    m_pad = _round_up(m, 128)
    cap = _vmem_capacity_bytes()
    tn_target = _choose_tn(m_pad, cap) if tn is None else max(128, _round_up(int(tn), 128))

    # Pick TN so it divides n whenever possible: no n padding, no output slice.
    if n <= tn_target:
        tn_eff, n_pad = n, n
    elif n % 128 == 0:
        tn_eff = 128
        for cand in range(tn_target, 127, -128):
            if n % cand == 0:
                tn_eff = cand
                break
        n_pad = n
    else:                       # awkward n: fall back to padding + slice
        tn_eff = tn_target
        n_pad = _round_up(n, tn_eff)
    n_tiles = n_pad // tn_eff

    # ---------- pack the xyz inputs (distance path stays f32) ----------
    kxyz = known.astype(f32)
    k2 = jnp.sum(kxyz * kxyz, axis=-1, keepdims=True)                    # (B, m, 1)
    kpack = jnp.concatenate([-2.0 * kxyz, k2, jnp.zeros((B, m, 4), f32)], axis=-1)
    if m_pad != m:                       # padded known points: huge distance, never selected
        pad = jnp.zeros((B, m_pad - m, 8), f32).at[:, :, 3].set(jnp.float32(1e30))
        kpack = jnp.concatenate([kpack, pad], axis=1)                    # (B, m_pad, 8)

    upack = jnp.concatenate([jnp.transpose(unknown.astype(f32), (0, 2, 1)),
                             jnp.ones((B, 1, n), f32),
                             jnp.zeros((B, 4, n), f32)], axis=1)          # (B, 8, n)
    uf = unknow_feats.astype(cd)                                          # (B, C1, n)
    if n_pad != n:
        upack = jnp.pad(upack, ((0, 0), (0, 0), (0, n_pad - n)))
        uf = jnp.pad(uf, ((0, 0), (0, 0), (0, n_pad - n)))

    # ---------- layer-1 weights: fold BN scale; optional pre-fold of known feats ----------
    scale0 = bn_scales[0].astype(f32)
    W1s = conv_weights[0].astype(f32) * scale0[:, None]                   # (Cout1, C2+C1)
    W1top, W1bot = W1s[:, :C2], W1s[:, C2:]
    if fold_first is None:
        fold_first = _round_up(cout1, 128) < _round_up(C2, 128)          # MXU lane-tile aware
    fold_first = bool(fold_first)

    if fold_first:
        kf_base = jnp.einsum('oc,bcm->bom', W1top, known_feats.astype(f32),
                             precision=hp)                                # (B, Cout1, m)
        K = cout1
    else:
        kf_base = known_feats.astype(f32)                                 # native (B, C2, m)
        K = C2
    if m_pad != m:
        kf_base = jnp.pad(kf_base, ((0, 0), (0, 0), (0, m_pad - m)))      # zero feats
    kf_in = kf_base.astype(cd)                                            # (B, K, m_pad)

    # ---------- assemble pallas_call operands ----------
    args = [kpack, upack, uf, kf_in]
    specs = [
        pl.BlockSpec((1, m_pad, 8), lambda b, t: (b, 0, 0)),      # resident across n tiles
        pl.BlockSpec((1, 8, tn_eff), lambda b, t: (b, 0, t)),
        pl.BlockSpec((1, C1, tn_eff), lambda b, t: (b, 0, t)),
        pl.BlockSpec((1, K, m_pad), lambda b, t: (b, 0, 0)),      # resident across n tiles
    ]

    def add_param(a):                                              # small 2-D parameters
        args.append(a)
        specs.append(pl.BlockSpec(a.shape, lambda b, t: (0, 0)))

    if not fold_first:
        add_param(W1top.astype(cd))
    add_param(W1bot.astype(cd))
    add_param(bn_shifts[0].astype(f32).reshape(cout1, 1))
    for l in range(1, num_layers):
        Wl = conv_weights[l].astype(f32) * bn_scales[l].astype(f32)[:, None]
        add_param(Wl.astype(cd))
        add_param(bn_shifts[l].astype(f32).reshape(-1, 1))

    # ---------- VMEM limit from the actual tile footprint ----------
    cd_bytes = cd.itemsize
    param_bytes = sum(int(a.size) * a.dtype.itemsize for a in args[4:])
    est = 10 * m_pad * tn_eff * 4                                 # NN-phase temporaries
    est += 2 * (m_pad * 8 * 4 + 8 * tn_eff * 4)                   # packed xyz (double-buffered)
    est += 2 * C1 * tn_eff * cd_bytes                             # unknow_feats tile
    est += 2 * K * m_pad * cd_bytes                               # known feats
    est += 2 * cout_last * tn_eff * 4                             # output tile
    est += 2 * param_bytes
    est += 4 * tn_eff * 4 * (sum(int(w.shape[0]) for w in conv_weights) + K)  # activations
    vmem_limit = int(min(0.9 * cap, max(1.5 * est + (16 << 20), 48 << 20)))

    out = pl.pallas_call(
        _make_fp_kernel(num_layers, fold_first, cd),
        out_shape=jax.ShapeDtypeStruct((B, cout_last, n_pad), f32),
        grid=(B, n_tiles),
        in_specs=specs,
        out_specs=pl.BlockSpec((1, cout_last, tn_eff), lambda b, t: (b, 0, t)),
        compiler_params=pltpu.CompilerParams(
            dimension_semantics=("parallel", "parallel"),
            vmem_limit_bytes=vmem_limit),
    )(*args)

    if n_pad != n:
        out = out[:, :, :n]
    return out                          # (B, mlp[-1], n), channels-first


def pointnet2_fp_reference(unknown, known, unknow_feats, known_feats,
                           conv_weights, bn_scales, bn_shifts):
    """Pure-JAX reference of the PyTorch forward (eval-mode BN), f32 HIGHEST precision."""
    hp = lax.Precision.HIGHEST
    d2 = (jnp.sum(unknown ** 2, -1)[:, :, None]
          + jnp.sum(known ** 2, -1)[:, None, :]
          - 2.0 * jnp.einsum('bnd,bmd->bnm', unknown, known, precision=hp))
    d2 = jnp.maximum(d2, 0.0)
    neg_vals, idx = lax.top_k(-d2, 3)                                # ascending distance
    dist = jnp.sqrt(-neg_vals)
    dr = 1.0 / (dist + 1e-8)
    w = dr / jnp.sum(dr, axis=-1, keepdims=True)                     # (B, n, 3)
    gathered = jax.vmap(lambda kf_b, idx_b: kf_b[:, idx_b])(known_feats, idx)  # (B,C2,n,3)
    interp = jnp.sum(gathered * w[:, None, :, :], axis=3)            # (B, C2, n)
    x = jnp.concatenate([interp, unknow_feats], axis=1)              # (B, C2+C1, n)
    for W, s, b in zip(conv_weights, bn_scales, bn_shifts):
        x = jnp.einsum('oc,bcn->bon', W, x, precision=hp)
        x = x * s.reshape(1, -1, 1) + b.reshape(1, -1, 1)
        x = jnp.maximum(x, 0.0)
    return x


if __name__ == "__main__":
    key = jax.random.PRNGKey(0)
    B, n, m = 2, 16, 8
    C1, C2 = 4, 4

    ks = jax.random.split(key, 4)
    unknown = jax.random.normal(ks[0], (B, n, 3), jnp.float32)
    known = jax.random.normal(ks[1], (B, m, 3), jnp.float32)
    unknow_feats = jax.random.normal(ks[2], (B, C1, n), jnp.float32)
    known_feats = jax.random.normal(ks[3], (B, C2, m), jnp.float32)

    def make_params(mlp, seed):
        kk = jax.random.split(jax.random.PRNGKey(seed), 5 * (len(mlp) - 1))
        conv_weights, bn_scales, bn_shifts = [], [], []
        for li in range(len(mlp) - 1):
            cin, cout = mlp[li], mlp[li + 1]
            w = jax.random.normal(kk[5 * li + 0], (cout, cin), jnp.float32) / jnp.sqrt(cin)
            gamma = 1.0 + 0.1 * jax.random.normal(kk[5 * li + 1], (cout,), jnp.float32)
            beta = 0.1 * jax.random.normal(kk[5 * li + 2], (cout,), jnp.float32)
            rmean = 0.05 * jax.random.normal(kk[5 * li + 3], (cout,), jnp.float32)
            rvar = jnp.abs(1.0 + 0.1 * jax.random.normal(kk[5 * li + 4], (cout,), jnp.float32))
            scale = gamma / jnp.sqrt(rvar + 1e-5)      # fold eval-mode BN into an affine
            shift = beta - rmean * scale
            conv_weights.append(w)
            bn_scales.append(scale)
            bn_shifts.append(shift)
        return conv_weights, bn_scales, bn_shifts

    configs = [
        ("mlp=[8,16,8]    f32",         [C1 + C2, 16, 8],     jnp.float32,  None, 2e-4, 2e-4),
        ("mlp=[8,16,8]    f32 folded",  [C1 + C2, 16, 8],     jnp.float32,  True, 2e-4, 2e-4),
        ("mlp=[8,8]       f32 1layer",  [C1 + C2, 8],         jnp.float32,  None, 2e-4, 2e-4),
        ("mlp=[8,16,32,8] f32 3layer",  [C1 + C2, 16, 32, 8], jnp.float32,  None, 2e-4, 2e-4),
        ("mlp=[8,16,8]    bf16",        [C1 + C2, 16, 8],     jnp.bfloat16, None, 1e-1, 1e-1),
    ]
    for name, mlp, cdtype, force_fold, rtol, atol in configs:
        cw, bs, bh = make_params(mlp, 42 + len(mlp))
        out = pointnet2_fp_pallas(unknown, known, unknow_feats, known_feats,
                                  cw, bs, bh, compute_dtype=cdtype,
                                  fold_first=force_fold)
        out = jax.block_until_ready(out)
        ref = pointnet2_fp_reference(unknown, known, unknow_feats, known_feats,
                                     cw, bs, bh)
        assert out.shape == (B, mlp[-1], n), (name, out.shape)
        err = float(jnp.max(jnp.abs(out - ref)))
        assert bool(jnp.allclose(out, ref, rtol=rtol, atol=atol)), (name, err)

    print("KERNEL_OK")
</pallas_src>

<mosaic_0001>
module attributes {stable_mosaic.version = 11 : i64} {
  func.func @kernel(%arg0: i32, %arg1: i32, %arg2: memref<1x128x8xf32, #tpu.memory_space<vmem>>, %arg3: memref<1x8x16xf32, #tpu.memory_space<vmem>>, %arg4: memref<1x4x16xf32, #tpu.memory_space<vmem>>, %arg5: memref<1x4x128xf32, #tpu.memory_space<vmem>>, %arg6: memref<16x4xf32, #tpu.memory_space<vmem>>, %arg7: memref<16x4xf32, #tpu.memory_space<vmem>>, %arg8: memref<16x1xf32, #tpu.memory_space<vmem>>, %arg9: memref<8x16xf32, #tpu.memory_space<vmem>>, %arg10: memref<8x1xf32, #tpu.memory_space<vmem>>, %arg11: memref<1x8x16xf32, #tpu.memory_space<vmem>>) attributes {dimension_semantics = [#tpu.dimension_semantics<parallel>, #tpu.dimension_semantics<parallel>], iteration_bounds = array<i64: 2, 1>, scalar_prefetch = 0 : i64, scratch_operands = 0 : i64, tpu.core_type = #tpu.core_type<tc>, window_params = [{transform_indices = @transform_0, window_bounds = array<i64: 1, 128, 8>}, {transform_indices = @transform_1, window_bounds = array<i64: 1, 8, 16>}, {transform_indices = @transform_2, window_bounds = array<i64: 1, 4, 16>}, {transform_indices = @transform_3, window_bounds = array<i64: 1, 4, 128>}, {pipeline_mode = #tpu.pipeline_mode<synchronous>, transform_indices = @transform_4, window_bounds = array<i64: 16, 4>}, {pipeline_mode = #tpu.pipeline_mode<synchronous>, transform_indices = @transform_5, window_bounds = array<i64: 16, 4>}, {pipeline_mode = #tpu.pipeline_mode<synchronous>, transform_indices = @transform_6, window_bounds = array<i64: 16, 1>}, {pipeline_mode = #tpu.pipeline_mode<synchronous>, transform_indices = @transform_7, window_bounds = array<i64: 8, 16>}, {pipeline_mode = #tpu.pipeline_mode<synchronous>, transform_indices = @transform_8, window_bounds = array<i64: 8, 1>}, {transform_indices = @transform_9, window_bounds = array<i64: 1, 8, 16>}]} {
    %c0 = arith.constant 0 : index
    %c0_0 = arith.constant 0 : index
    %c0_1 = arith.constant 0 : index
    %0 = vector.load %arg2[%c0, %c0_0, %c0_1] : memref<1x128x8xf32, #tpu.memory_space<vmem>>, vector<1x128x8xf32>
    %1 = vector.shape_cast %0 : vector<1x128x8xf32> to vector<128x8xf32>
    %c0_2 = arith.constant 0 : index
    %c0_3 = arith.constant 0 : index
    %c0_4 = arith.constant 0 : index
    %2 = vector.load %arg3[%c0_2, %c0_3, %c0_4] : memref<1x8x16xf32, #tpu.memory_space<vmem>>, vector<1x8x16xf32>
    %3 = vector.shape_cast %2 : vector<1x8x16xf32> to vector<8x16xf32>
    %cst = arith.constant dense<0.000000e+00> : vector<128x16xf32>
    %4 = tpu.matmul %1, %3, %cst {dimension_numbers = #tpu.dot_dimension_numbers<[1], [0], [0], [1], [0, 0, 1, 1], [], []>} : vector<128x8xf32>, vector<8x16xf32>, vector<128x16xf32> -> vector<128x16xf32>
    %5 = arith.mulf %3, %3 : vector<8x16xf32>
    %cst_5 = arith.constant dense<0.000000e+00> : vector<16xf32>
    %6 = vector.multi_reduction <add>, %5, %cst_5 [0] : vector<8x16xf32> to vector<16xf32>
    %7 = vector.shape_cast %6 : vector<16xf32> to vector<1x16xf32>
    %cst_6 = arith.constant 1.000000e+00 : f32
    %8 = vector.broadcast %cst_6 : f32 to vector<1x16xf32>
    %9 = arith.subf %7, %8 : vector<1x16xf32>
    %10 = tpu.iota {dimensions = array<i32: 0>} : vector<128x16xi32>
    %11 = arith.sitofp %10 : vector<128x16xi32> to vector<128x16xf32>
    %cst_7 = arith.constant dense<0x7F800000> : vector<16xf32>
    %12 = vector.multi_reduction <minimumf>, %4, %cst_7 [0] : vector<128x16xf32> to vector<16xf32>
    %13 = vector.shape_cast %12 : vector<16xf32> to vector<1x16xf32>
    %14 = vector.broadcast %13 : vector<1x16xf32> to vector<128x16xf32>
    %15 = arith.cmpf ole, %4, %14 : vector<128x16xf32>
    %cst_8 = arith.constant 1.280000e+02 : f32
    %16 = vector.broadcast %cst_8 : f32 to vector<128x16xf32>
    %17 = arith.select %15, %11, %16 : vector<128x16xi1>, vector<128x16xf32>
    %cst_9 = arith.constant dense<0x7F800000> : vector<16xf32>
    %18 = vector.multi_reduction <minimumf>, %17, %cst_9 [0] : vector<128x16xf32> to vector<16xf32>
    %19 = vector.shape_cast %18 : vector<16xf32> to vector<1x16xf32>
    %20 = vector.broadcast %19 : vector<1x16xf32> to vector<128x16xf32>
    %21 = arith.cmpf oeq, %11, %20 : vector<128x16xf32>
    %22 = arith.addf %13, %9 : vector<1x16xf32>
    %cst_10 = arith.constant 0.000000e+00 : f32
    %23 = vector.broadcast %cst_10 : f32 to vector<1x16xf32>
    %24 = arith.maximumf %22, %23 : vector<1x16xf32>
    %25 = math.sqrt %24 : vector<1x16xf32>
    %cst_11 = arith.constant 9.99999993E-9 : f32
    %26 = vector.broadcast %cst_11 : f32 to vector<1x16xf32>
    %27 = arith.addf %25, %26 : vector<1x16xf32>
    %cst_12 = arith.constant 1.000000e+00 : f32
    %28 = vector.broadcast %cst_12 : f32 to vector<1x16xf32>
    %29 = arith.divf %28, %27 : vector<1x16xf32>
    %cst_13 = arith.constant 0.000000e+00 : f32
    %30 = vector.shape_cast %29 : vector<1x16xf32> to vector<1x16xf32>
    %31 = vector.broadcast %30 : vector<1x16xf32> to vector<128x16xf32>
    %32 = vector.broadcast %cst_13 : f32 to vector<128x16xf32>
    %33 = arith.select %21, %31, %32 : vector<128x16xi1>, vector<128x16xf32>
    %cst_14 = arith.constant 3.000000e+38 : f32
    %34 = vector.broadcast %cst_14 : f32 to vector<128x16xf32>
    %35 = arith.select %21, %34, %4 : vector<128x16xi1>, vector<128x16xf32>
    %cst_15 = arith.constant dense<0x7F800000> : vector<16xf32>
    %36 = vector.multi_reduction <minimumf>, %35, %cst_15 [0] : vector<128x16xf32> to vector<16xf32>
    %37 = vector.shape_cast %36 : vector<16xf32> to vector<1x16xf32>
    %38 = vector.broadcast %37 : vector<1x16xf32> to vector<128x16xf32>
    %39 = arith.cmpf ole, %35, %38 : vector<128x16xf32>
    %cst_16 = arith.constant 1.280000e+02 : f32
    %40 = vector.broadcast %cst_16 : f32 to vector<128x16xf32>
    %41 = arith.select %39, %11, %40 : vector<128x16xi1>, vector<128x16xf32>
    %cst_17 = arith.constant dense<0x7F800000> : vector<16xf32>
    %42 = vector.multi_reduction <minimumf>, %41, %cst_17 [0] : vector<128x16xf32> to vector<16xf32>
    %43 = vector.shape_cast %42 : vector<16xf32> to vector<1x16xf32>
    %44 = vector.broadcast %43 : vector<1x16xf32> to vector<128x16xf32>
    %45 = arith.cmpf oeq, %11, %44 : vector<128x16xf32>
    %46 = arith.addf %37, %9 : vector<1x16xf32>
    %cst_18 = arith.constant 0.000000e+00 : f32
    %47 = vector.broadcast %cst_18 : f32 to vector<1x16xf32>
    %48 = arith.maximumf %46, %47 : vector<1x16xf32>
    %49 = math.sqrt %48 : vector<1x16xf32>
    %cst_19 = arith.constant 9.99999993E-9 : f32
    %50 = vector.broadcast %cst_19 : f32 to vector<1x16xf32>
    %51 = arith.addf %49, %50 : vector<1x16xf32>
    %cst_20 = arith.constant 1.000000e+00 : f32
    %52 = vector.broadcast %cst_20 : f32 to vector<1x16xf32>
    %53 = arith.divf %52, %51 : vector<1x16xf32>
    %cst_21 = arith.constant 0.000000e+00 : f32
    %54 = vector.shape_cast %53 : vector<1x16xf32> to vector<1x16xf32>
    %55 = vector.broadcast %54 : vector<1x16xf32> to vector<128x16xf32>
    %56 = vector.broadcast %cst_21 : f32 to vector<128x16xf32>
    %57 = arith.select %45, %55, %56 : vector<128x16xi1>, vector<128x16xf32>
    %58 = arith.addf %33, %57 : vector<128x16xf32>
    %59 = arith.addf %29, %53 : vector<1x16xf32>
    %cst_22 = arith.constant 3.000000e+38 : f32
    %60 = vector.broadcast %cst_22 : f32 to vector<128x16xf32>
    %61 = arith.select %45, %60, %35 : vector<128x16xi1>, vector<128x16xf32>
    %cst_23 = arith.constant dense<0x7F800000> : vector<16xf32>
    %62 = vector.multi_reduction <minimumf>, %61, %cst_23 [0] : vector<128x16xf32> to vector<16xf32>
    %63 = vector.shape_cast %62 : vector<16xf32> to vector<1x16xf32>
    %64 = vector.broadcast %63 : vector<1x16xf32> to vector<128x16xf32>
    %65 = arith.cmpf ole, %61, %64 : vector<128x16xf32>
    %cst_24 = arith.constant 1.280000e+02 : f32
    %66 = vector.broadcast %cst_24 : f32 to vector<128x16xf32>
    %67 = arith.select %65, %11, %66 : vector<128x16xi1>, vector<128x16xf32>
    %cst_25 = arith.constant dense<0x7F800000> : vector<16xf32>
    %68 = vector.multi_reduction <minimumf>, %67, %cst_25 [0] : vector<128x16xf32> to vector<16xf32>
    %69 = vector.shape_cast %68 : vector<16xf32> to vector<1x16xf32>
    %70 = vector.broadcast %69 : vector<1x16xf32> to vector<128x16xf32>
    %71 = arith.cmpf oeq, %11, %70 : vector<128x16xf32>
    %72 = arith.addf %63, %9 : vector<1x16xf32>
    %cst_26 = arith.constant 0.000000e+00 : f32
    %73 = vector.broadcast %cst_26 : f32 to vector<1x16xf32>
    %74 = arith.maximumf %72, %73 : vector<1x16xf32>
    %75 = math.sqrt %74 : vector<1x16xf32>
    %cst_27 = arith.constant 9.99999993E-9 : f32
    %76 = vector.broadcast %cst_27 : f32 to vector<1x16xf32>
    %77 = arith.addf %75, %76 : vector<1x16xf32>
    %cst_28 = arith.constant 1.000000e+00 : f32
    %78 = vector.broadcast %cst_28 : f32 to vector<1x16xf32>
    %79 = arith.divf %78, %77 : vector<1x16xf32>
    %cst_29 = arith.constant 0.000000e+00 : f32
    %80 = vector.shape_cast %79 : vector<1x16xf32> to vector<1x16xf32>
    %81 = vector.broadcast %80 : vector<1x16xf32> to vector<128x16xf32>
    %82 = vector.broadcast %cst_29 : f32 to vector<128x16xf32>
    %83 = arith.select %71, %81, %82 : vector<128x16xi1>, vector<128x16xf32>
    %84 = arith.addf %58, %83 : vector<128x16xf32>
    %85 = arith.addf %59, %79 : vector<1x16xf32>
    %cst_30 = arith.constant 1.000000e+00 : f32
    %86 = vector.broadcast %cst_30 : f32 to vector<1x16xf32>
    %87 = arith.divf %86, %85 : vector<1x16xf32>
    %c0_31 = arith.constant 0 : index
    %c0_32 = arith.constant 0 : index
    %c0_33 = arith.constant 0 : index
    %88 = vector.load %arg5[%c0_31, %c0_32, %c0_33] : memref<1x4x128xf32, #tpu.memory_space<vmem>>, vector<1x4x128xf32>
    %89 = vector.shape_cast %88 : vector<1x4x128xf32> to vector<4x128xf32>
    %cst_34 = arith.constant dense<0.000000e+00> : vector<4x16xf32>
    %90 = tpu.matmul %89, %84, %cst_34 {dimension_numbers = #tpu.dot_dimension_numbers<[1], [0], [0], [1], [0, 0, 1, 1], [], []>} : vector<4x128xf32>, vector<128x16xf32>, vector<4x16xf32> -> vector<4x16xf32>
    %91 = vector.broadcast %87 : vector<1x16xf32> to vector<4x16xf32>
    %92 = arith.mulf %90, %91 : vector<4x16xf32>
    %c0_35 = arith.constant 0 : index
    %c0_36 = arith.constant 0 : index
    %c0_37 = arith.constant 0 : index
    %93 = vector.load %arg4[%c0_35, %c0_36, %c0_37] : memref<1x4x16xf32, #tpu.memory_space<vmem>>, vector<1x4x16xf32>
    %94 = vector.shape_cast %93 : vector<1x4x16xf32> to vector<4x16xf32>
    %c0_38 = arith.constant 0 : index
    %c0_39 = arith.constant 0 : index
    %95 = vector.load %arg6[%c0_38, %c0_39] : memref<16x4xf32, #tpu.memory_space<vmem>>, vector<16x4xf32>
    %cst_40 = arith.constant dense<0.000000e+00> : vector<16x16xf32>
    %96 = tpu.matmul %95, %92, %cst_40 {dimension_numbers = #tpu.dot_dimension_numbers<[1], [0], [0], [1], [0, 0, 1, 1], [], []>} : vector<16x4xf32>, vector<4x16xf32>, vector<16x16xf32> -> vector<16x16xf32>
    %c0_41 = arith.constant 0 : index
    %c0_42 = arith.constant 0 : index
    %97 = vector.load %arg7[%c0_41, %c0_42] : memref<16x4xf32, #tpu.memory_space<vmem>>, vector<16x4xf32>
    %cst_43 = arith.constant dense<0.000000e+00> : vector<16x16xf32>
    %98 = tpu.matmul %97, %94, %cst_43 {dimension_numbers = #tpu.dot_dimension_numbers<[1], [0], [0], [1], [0, 0, 1, 1], [], []>} : vector<16x4xf32>, vector<4x16xf32>, vector<16x16xf32> -> vector<16x16xf32>
    %99 = arith.addf %96, %98 : vector<16x16xf32>
    %c0_44 = arith.constant 0 : index
    %c0_45 = arith.constant 0 : index
    %100 = vector.load %arg8[%c0_44, %c0_45] : memref<16x1xf32, #tpu.memory_space<vmem>>, vector<16x1xf32>
    %101 = vector.broadcast %100 : vector<16x1xf32> to vector<16x16xf32>
    %102 = arith.addf %99, %101 : vector<16x16xf32>
    %cst_46 = arith.constant 0.000000e+00 : f32
    %103 = vector.broadcast %cst_46 : f32 to vector<16x16xf32>
    %104 = arith.maximumf %102, %103 : vector<16x16xf32>
    %c0_47 = arith.constant 0 : index
    %c0_48 = arith.constant 0 : index
    %105 = vector.load %arg9[%c0_47, %c0_48] : memref<8x16xf32, #tpu.memory_space<vmem>>, vector<8x16xf32>
    %cst_49 = arith.constant dense<0.000000e+00> : vector<8x16xf32>
    %106 = tpu.matmul %105, %104, %cst_49 {dimension_numbers = #tpu.dot_dimension_numbers<[1], [0], [0], [1], [0, 0, 1, 1], [], []>} : vector<8x16xf32>, vector<16x16xf32>, vector<8x16xf32> -> vector<8x16xf32>
    %c0_50 = arith.constant 0 : index
    %c0_51 = arith.constant 0 : index
    %107 = vector.load %arg10[%c0_50, %c0_51] : memref<8x1xf32, #tpu.memory_space<vmem>>, vector<8x1xf32>
    %108 = vector.broadcast %107 : vector<8x1xf32> to vector<8x16xf32>
    %109 = arith.addf %106, %108 : vector<8x16xf32>
    %cst_52 = arith.constant 0.000000e+00 : f32
    %110 = vector.broadcast %cst_52 : f32 to vector<8x16xf32>
    %111 = arith.maximumf %109, %110 : vector<8x16xf32>
    %c0_53 = arith.constant 0 : index
    %c0_54 = arith.constant 0 : index
    %c0_55 = arith.constant 0 : index
    %112 = vector.load %arg11[%c0_53, %c0_54, %c0_55] : memref<1x8x16xf32, #tpu.memory_space<vmem>>, vector<1x8x16xf32>
    %113 = vector.shape_cast %112 : vector<1x8x16xf32> to vector<8x16xf32>
    %114 = vector.shape_cast %111 : vector<8x16xf32> to vector<1x8x16xf32>
    tpu.vector_store %arg11[%c0_53, %c0_54, %c0_55], %114 {strides = array<i32>} : memref<1x8x16xf32, #tpu.memory_space<vmem>>, vector<1x8x16xf32>,
    return
  }
  func.func @transform_0(%arg0: i32, %arg1: i32) -> (i32, i32, i32) {
    %c0_i32 = arith.constant 0 : i32
    %c0_i32_0 = arith.constant 0 : i32
    %c0_i32_1 = arith.constant 0 : i32
    return %arg0, %c0_i32, %c0_i32_0 : i32, i32, i32
  }
  func.func @transform_1(%arg0: i32, %arg1: i32) -> (i32, i32, i32) {
    %c0_i32 = arith.constant 0 : i32
    %c0_i32_0 = arith.constant 0 : i32
    return %arg0, %c0_i32, %arg1 : i32, i32, i32
  }
  func.func @transform_2(%arg0: i32, %arg1: i32) -> (i32, i32, i32) {
    %c0_i32 = arith.constant 0 : i32
    %c0_i32_0 = arith.constant 0 : i32
    return %arg0, %c0_i32, %arg1 : i32, i32, i32
  }
  func.func @transform_3(%arg0: i32, %arg1: i32) -> (i32, i32, i32) {
    %c0_i32 = arith.constant 0 : i32
    %c0_i32_0 = arith.constant 0 : i32
    %c0_i32_1 = arith.constant 0 : i32
    return %arg0, %c0_i32, %c0_i32_0 : i32, i32, i32
  }
  func.func @transform_4(%arg0: i32, %arg1: i32) -> (i32, i32) {
    %c0_i32 = arith.constant 0 : i32
    %c0_i32_0 = arith.constant 0 : i32
    %c0_i32_1 = arith.constant 0 : i32
    return %c0_i32, %c0_i32_0 : i32, i32
  }
  func.func @transform_5(%arg0: i32, %arg1: i32) -> (i32, i32) {
    %c0_i32 = arith.constant 0 : i32
    %c0_i32_0 = arith.constant 0 : i32
    %c0_i32_1 = arith.constant 0 : i32
    return %c0_i32, %c0_i32_0 : i32, i32
  }
  func.func @transform_6(%arg0: i32, %arg1: i32) -> (i32, i32) {
    %c0_i32 = arith.constant 0 : i32
    %c0_i32_0 = arith.constant 0 : i32
    %c0_i32_1 = arith.constant 0 : i32
    return %c0_i32, %c0_i32_0 : i32, i32
  }
  func.func @transform_7(%arg0: i32, %arg1: i32) -> (i32, i32) {
    %c0_i32 = arith.constant 0 : i32
    %c0_i32_0 = arith.constant 0 : i32
    %c0_i32_1 = arith.constant 0 : i32
    return %c0_i32, %c0_i32_0 : i32, i32
  }
  func.func @transform_8(%arg0: i32, %arg1: i32) -> (i32, i32) {
    %c0_i32 = arith.constant 0 : i32
    %c0_i32_0 = arith.constant 0 : i32
    %c0_i32_1 = arith.constant 0 : i32
    return %c0_i32, %c0_i32_0 : i32, i32
  }
  func.func @transform_9(%arg0: i32, %arg1: i32) -> (i32, i32, i32) {
    %c0_i32 = arith.constant 0 : i32
    %c0_i32_0 = arith.constant 0 : i32
    return %arg0, %c0_i32, %arg1 : i32, i32, i32
  }
}

</mosaic_0001>

<bundles_post_ra>
// kernel: tpu_custom_call.1
= control target key start
LH: loop header
LB: loop body
LE: loop exit
PB: predicated region body
PF: predicated region fallthrough
CT: control target
= control target key end

     0   :  { %14 = vsyncpa [#allocation3], 0  ;;  %s2933_s0 = inlined_call_operand.vmem [shape: f32[2,128,8], index: 0, kind: input, shape index: {}]   ;;  %s2934_s1 = inlined_call_operand.vmem [shape: f32[2,8,16], index: 1, kind: input, shape index: {}]   ;;  %s2935_s2 = inlined_call_operand.vmem [shape: f32[2,4,16], index: 2, kind: input, shape index: {}]   ;;  %s2936_s3 = inlined_call_operand.vmem [shape: f32[2,4,128], index: 3, kind: input, shape index: {}]   ;;  %s2937_s4 = inlined_call_operand.vmem [shape: f32[16,4], index: 4, kind: input, shape index: {}]   ;;  %s2938_s5 = inlined_call_operand.vmem [shape: f32[16,4], index: 5, kind: input, shape index: {}]   ;;  %s2939_s6 = inlined_call_operand.vmem [shape: f32[16,1], index: 6, kind: input, shape index: {}]   ;;  %s2940_s7 = inlined_call_operand.vmem [shape: f32[8,16], index: 7, kind: input, shape index: {}]   ;;  %s2941_s8 = inlined_call_operand.vmem [shape: f32[8,1], index: 8, kind: input, shape index: {}]   ;;  %s2942_s9 = inlined_call_operand.hbm [shape: f32[2,8,16], index: 9, kind: output, shape index: {}]  }
   0x1   :  { %16 = vsyncpa [#allocation3 + $0x1], 0  ;;  %s1690_s30 = smov 0   ;;  %s1692_s10 = smov 0  }
   0x2   :  { %s1694_s11 = smov 0   ;;  %s1696_s12 = smov 0  }
   0x3   :  { %s1698_s13 = smov 0   ;;  %s1700_s14 = smov 0  }
   0x4 LB: > { %s1445_s15 = sadd.s32 4294967295, %s1637_s14   ;;  %s1446_s16 = sadd.s32 4294967294, %s1637_s14   ;;  %s1637_s14 = sphi %s1700_s14, %s22_s14   ;;  %s1633_s13 = sphi %s1698_s13, %s3104_s13   ;;  %s1629_s12 = sphi %s1696_s12, %s3103_s12   ;;  %s1625_s11 = sphi %s1694_s11, %s3102_s11   ;;  %s1621_s10 = sphi %s1692_s10, %s3101_s10   ;;  %s1617_s30 = sphi %s1690_s30, %s3100_s30  }
   0x5   : > { %s34_s17 = sadd.s32 1, %s1633_s13  ;;  %s256_s18 = sadd.s32 1, %s1625_s11 }
   0x6   : > { %p36_p0 = scmp.ge.s32.totalorder %s34_s17, 2  ;;  %p266_p1 = scmp.ne.s32.totalorder %s1625_s11, %s1621_s10 }
   0x7   : > { %p267_p2 = scmp.eq.s32.totalorder %s1445_s15, 1  ;;  %p272_p3 = scmp.ne.s32.totalorder %s1621_s10, %s1617_s30 }
   0x8   : > { %s3106_s17 = smov (%p36_p0, %s34_s17), 0  ;;  %p273_p5 = scmp.eq.s32.totalorder %s1446_s16, 1 }
   0x9   : > { %p1730_p4 = por %p267_p2, %p266_p1  ;;  %s251_s20 = ssub.s32 %s1633_s13, %s3106_s17 }
   0xa   : > { %p1449_p6 = scmp.ge.s32.totalorder %s1637_s14, 1  ;;  %p254_p7 = scmp.eq.s32.totalorder %s251_s20, 0 }
   0xb   : > { %p1737_p8 = por %p273_p5, %p272_p3  ;;  %p341_p9 = scmp.lt.s32.totalorder %s1637_s14, 3 }
   0xc   : > { %s1743_s22 = scalar_select %p254_p7, %s1625_s11, %s256_s18  }
   0xd   : > { %p342_p10 = pnand %p1449_p6, %p341_p9 }
   0xf   : > { %345 = sbr.rel (%p342_p10) target bundleno = 906 (0x38a), region = 56 }
  0x14   : > { %p395_p11 = scmp.lt.s32.totalorder %s1629_s12, 1  ;;  %vm435_vm0 = vcmask 64512   ;;  %vm2943_vm1 = vcmask 130048  }
  0x16   : > { %s1747_s23 = scalar_select %p395_p11, %s1629_s12, 1 }
  0x18   : > { %s1484_s24 = sshll.u32 %s1747_s23, 7  ;;  %s1453_s25 = sshll.u32 %s1747_s23, 3 }
  0x19   : > { %s1754_s28 = scalar_lea.vmem %s2933_s0, %s1484_s24  ;;  %s406_s16 = scalar_lea.vmem %s2934_s1, %s1453_s25 }
  0x1a   : > { %v434_v0 = vld [vmem:[%s406_s16] sm:$0xff]  ;;  %v429_v2 = vld [vmem:[%s1754_s28 + $0x58] sm:$0xff]  ;;  %v419_v4 = vld [vmem:[%s1754_s28 + $0x8] sm:$0xff]  ;;  %s1454_s18 = sshll.u32 %s1747_s23, 2  ;;  %s392_s24 = sand.u32 1, %s1621_s10  }
  0x1b   : > { %v418_v1 = vld [vmem:[%s1754_s28] sm:$0xff]  ;;  %499 = vmatpush.msra.mxu0 %v434_v0  ;;  %1486 = vmatpush.msra.mxu3 %v434_v0  ;;  %v425_v3 = vld [vmem:[%s1754_s28 + $0x38] sm:$0xff]  ;;  %v420_v7 = vld [vmem:[%s1754_s28 + $0x10] sm:$0xff]  ;;  %v549_v26 = vmul.f32 %v434_v0, %v434_v0  ;;  %s417_s25 = scalar_lea.vmem %s2936_s3, %s1454_s18  ;;  %s1319_s16 = scalar_lea.sflag [#allocation3], %s392_s24 }
  0x1c   : > { %1456 = vmatmul.msk.f32.vlgmr.msra.gmra.mxu0 %vm435_vm0, %v418_v1  ;;  %1467 = vmatmul.msk.f32.vlgmr.msra.gmra.mxu3 %vm435_vm0, %v429_v2  ;;  %v430_v5 = vld [vmem:[%s1754_s28 + $0x60] sm:$0xff]  ;;  %v431_v8 = vld [vmem:[%s1754_s28 + $0x68] sm:$0xff]  ;;  %v421_v10 = vld [vmem:[%s1754_s28 + $0x18] sm:$0xff] }
  0x1d   : > { %1485 = vmatpush.msra.mxu2 %v434_v0  ;;  %v426_v6 = vld [vmem:[%s1754_s28 + $0x40] sm:$0xff]  ;;  %v427_v9 = vld [vmem:[%s1754_s28 + $0x48] sm:$0xff]  ;;  %v432_v11 = vld [vmem:[%s1754_s28 + $0x70] sm:$0xff]  ;;  %v551_v28 = vsel %vm2943_vm1, %v549_v26, 0.0 }
  0x1e   : > { %1463 = vmatmul.msk.f32.vlgmr.msra.gmra.mxu2 %vm435_vm0, %v425_v3  ;;  %v428_v12 = vld [vmem:[%s1754_s28 + $0x50] sm:$0xff]  ;;  %v422_v13 = vld [vmem:[%s1754_s28 + $0x20] sm:$0xff]  ;;  %v433_v14 = vld [vmem:[%s1754_s28 + $0x78] sm:$0xff]  ;;  %v552_v31 = vrot.slane %v551_v28, 4 }
  0x1f   : > { %v423_v15 = vld [vmem:[%s1754_s28 + $0x28] sm:$0xff]  ;;  %v424_v16 = vld [vmem:[%s1754_s28 + $0x30] sm:$0xff]  ;;  %s413_s28 = scalar_lea.vmem %s2935_s2, %s1454_s18  ;;  %s1450_s18 = sshll.u32 %s392_s24, 3 }
  0x20   : > { %v553_v34 = vadd.f32 %v552_v31, %v551_v28  ;;  %s394_s29 = scalar_lea.vmem [#allocation2], %s1450_s18  ;;  %s1579_s18 = scalar_lea.hbm %s2942_s9, 16 }
  0x21   : > { %s1332_s15 = sshll.u32 %s394_s29, 4  ;;  %s1333_s15 = int_to_ptr.vmem [resolvable:$true] %s1332_s15 }
  0x22   : > { %v554_v44 = vrot.slane %v553_v34, 2 }
  0x24   : > { %1457 = vmatmul.msk.f32.gmra.mxu0 %vm435_vm0, %v419_v4  ;;  %1468 = vmatmul.msk.f32.gmra.mxu3 %vm435_vm0, %v430_v5  ;;  %v555_v55 = vadd.f32 %v554_v44, %v553_v34  ;;  %v559_v4 = vlaneseq }
  0x26   : > { %1464 = vmatmul.msk.f32.gmra.mxu2 %vm435_vm0, %v426_v6  ;;  %v556_v3 = vrot.slane %v555_v55, 1 }
  0x2c   : > { %1458 = vmatmul.msk.f32.gmra.mxu0 %vm435_vm0, %v420_v7  ;;  %1469 = vmatmul.msk.f32.gmra.mxu3 %vm435_vm0, %v431_v8  ;;  %v557_v8 = vadd.f32 %v556_v3, %v555_v55 }
  0x2e   : > { %1465 = vmatmul.msk.f32.gmra.mxu2 %vm435_vm0, %v427_v9  ;;  %v560_v9 = vshrl.u32 %v559_v4, 7 }
  0x30   : > { %v565_v26 = vadd.s32 40, %v560_v9  ;;  %v566_v28 = vadd.s32 48, %v560_v9  ;;  %v568_v34 = vadd.s32 64, %v560_v9  ;;  %v1858_v44 = vcvt.s32.f32 %v560_v9 }
  0x32   : > { %v1874_v55 = vcvt.s32.f32 %v568_v34 }
  0x34   : > { %1459 = vmatmul.msk.f32.gmra.mxu0 %vm435_vm0, %v421_v10  ;;  %1470 = vmatmul.msk.f32.gmra.mxu3 %vm435_vm0, %v432_v11 }
  0x36   : > { %1466 = vmatmul.msk.f32.gmra.mxu2 %vm435_vm0, %v428_v12  ;;  %v1856_v12 = vadd.f32 -1.0, %v557_v8 }
  0x3c   : > { %1460 = vmatmul.msk.f32.gmra.mxu0 %vm435_vm0, %v422_v13  ;;  %1471 = vmatmul.msk.f32.gmra.mxu3 %vm435_vm0, %v433_v14  ;;  %v561_v13 = vadd.s32 8, %v560_v9  ;;  %v562_v14 = vadd.s32 16, %v560_v9 }
  0x44   : > { %1461 = vmatmul.msk.f32.gmra.mxu0 %vm435_vm0, %v423_v15  ;;  %v563_v15 = vadd.s32 24, %v560_v9 }
  0x4c   : > { %1462 = vmatmul.msk.f32.gmra.mxu0 %vm435_vm0, %v424_v16  ;;  %v564_v16 = vadd.s32 32, %v560_v9 }
  0x99   : > { %v1791_v17 = vpop.f32.mrf.mxu0 }
  0x9a   : > { %v592_v38 = vsel %vm2943_vm1, %v1791_v17, inf }
  0x9f   : > { %v1793_v18 = vpop.f32.mrf.mxu3 }
  0xa0   : > { %v610_v56 = vsel %vm2943_vm1, %v1793_v18, inf }
  0xa1   : > { %v1795_v19 = vpop.f32.mrf.mxu0  ;;  %v1801_v22 = vpop.f32.mrf.mxu2 }
  0xa2   : > { %v593_v35 = vsel %vm2943_vm1, %v1795_v19, inf  ;;  %v602_v40 = vsel %vm2943_vm1, %v1801_v22, inf }
  0xa7   : > { %v1799_v21 = vpop.f32.mrf.mxu3 }
  0xa8   : > { %v612_v62 = vsel %vm2943_vm1, %v1799_v21, inf }
  0xa9   : > { %v1797_v20 = vpop.f32.mrf.mxu0  ;;  %v1805_v24 = vpop.f32.mrf.mxu2 }
  0xaa   : > { %v604_v45 = vsel %vm2943_vm1, %v1805_v24, inf  ;;  %v594_v50 = vsel %vm2943_vm1, %v1797_v20, inf }
  0xaf   : > { %v1807_v25 = vpop.f32.mrf.mxu3 }
  0xb0   : > { %v614_v57 = vsel %vm2943_vm1, %v1807_v25, inf }
  0xb1   : > { %v1803_v23 = vpop.f32.mrf.mxu0  ;;  %v1812_v29 = vpop.f32.mrf.mxu2 }
  0xb2   : > { %v595_v39 = vsel %vm2943_vm1, %v1803_v23, inf  ;;  %v606_v41 = vsel %vm2943_vm1, %v1812_v29, inf }
  0xb3   : > { %v603_v46 = vmin.f32 %v595_v39, %v602_v40  ;;  %v573_v39 = vadd.s32 104, %v560_v9 }
  0xb5   : > { %v611_v59 = vmin.f32 %v603_v46, %v610_v56  ;;  %v1862_v46 = vcvt.s32.f32 %v562_v14 }
  0xb7   : > { %v1814_v30 = vpop.f32.mrf.mxu3 }
  0xb8   : > { %v616_v63 = vsel %vm2943_vm1, %v1814_v30, inf }
  0xb9   : > { %v1809_v27 = vpop.f32.mrf.mxu0  ;;  %v1832_v43 = vpop.f32.mrf.mxu2 }
  0xba   : > { %v596_v36 = vsel %vm2943_vm1, %v1809_v27, inf  ;;  %v608_v52 = vsel %vm2943_vm1, %v1832_v43, inf }
  0xbb   : > { %v597_v42 = vmin.f32 %v592_v38, %v596_v36  ;;  %v570_v36 = vadd.s32 80, %v560_v9  ;;  %v572_v38 = vadd.s32 96, %v560_v9 }
  0xbd   : > { %v605_v53 = vmin.f32 %v597_v42, %v604_v45  ;;  %v575_v42 = vadd.s32 120, %v560_v9  ;;  %v1860_v45 = vcvt.s32.f32 %v561_v13 }
  0xbf   : > { %v1836_v47 = vpop.f32.mrf.mxu3  ;;  %v613_v0 = vmin.f32 %v605_v53, %v612_v62  ;;  %v1870_v53 = vcvt.s32.f32 %v566_v28 }
  0xc0   : > { %v618_v58 = vsel %vm2943_vm1, %v1836_v47, inf }
  0xc1   : > { %v1816_v32 = vpop.f32.mrf.mxu0  ;;  %v619_v1 = vmin.f32 %v611_v59, %v618_v58 }
  0xc2   : > { %v598_v33 = vsel %vm2943_vm1, %v1816_v32, inf }
  0xc3   : > { %v599_v37 = vmin.f32 %v593_v35, %v598_v33  ;;  %v567_v33 = vadd.s32 56, %v560_v9  ;;  %v569_v35 = vadd.s32 72, %v560_v9 }
  0xc5   : > { %v607_v48 = vmin.f32 %v599_v37, %v606_v41  ;;  %v571_v37 = vadd.s32 88, %v560_v9  ;;  %v574_v41 = vadd.s32 112, %v560_v9  ;;  %v1876_v56 = vcvt.s32.f32 %v569_v35 }
  0xc7   : > { %v615_v60 = vmin.f32 %v607_v48, %v614_v57  ;;  %v1864_v48 = vcvt.s32.f32 %v563_v15  ;;  %v1878_v57 = vcvt.s32.f32 %v570_v36  ;;  %v1880_v58 = vcvt.s32.f32 %v571_v37 }
  0xc8   : > { %v1888_v62 = vcvt.s32.f32 %v574_v41 }
  0xc9   : > { %v1838_v49 = vpop.f32.mrf.mxu0  ;;  %v620_v5 = vmin.f32 %v613_v0, %v615_v60  ;;  %v1884_v60 = vcvt.s32.f32 %v572_v38 }
  0xca   : > { %v600_v51 = vsel %vm2943_vm1, %v1838_v49, inf }
  0xcb   : > { %v601_v54 = vmin.f32 %v594_v50, %v600_v51  ;;  %v1866_v50 = vcvt.s32.f32 %v564_v16 }
  0xcd   : > { %v609_v61 = vmin.f32 %v601_v54, %v608_v52  ;;  %v1868_v52 = vcvt.s32.f32 %v565_v26  ;;  %v1872_v54 = vcvt.s32.f32 %v567_v33 }
  0xcf   : > { %v617_v2 = vmin.f32 %v609_v61, %v616_v63  ;;  %v1886_v61 = vcvt.s32.f32 %v573_v39  ;;  %v1890_v63 = vcvt.s32.f32 %v575_v42 }
  0xd1   : > { %v621_v6 = vmin.f32 %v617_v2, %v619_v1 }
  0xd3   : > { %v622_v7 = vmin.f32 %v620_v5, %v621_v6 }
  0xd5   : > { %v623_v10 = vrot.slane %v622_v7, 4 }
  0xd7   : > { %v624_v11 = vmin.f32 %v622_v7, %v623_v10 }
  0xd9   : > { %v625_v31 = vrot.slane %v624_v11, 2 }
  0xdb   : > { %v626_v40 = vmin.f32 %v624_v11, %v625_v31 }
  0xdd   : > { %v627_v51 = vrot.slane %v626_v40, 1 }
  0xdf   : > { %v1882_v59 = vmin.f32 %v626_v40, %v627_v51 }
  0xe1   : > { %vm629_vm2 = vcmp.le.f32.partialorder %v1791_v17, %v1882_v59  ;;  %vm630_vm3 = vcmp.le.f32.partialorder %v1795_v19, %v1882_v59  ;;  %vm631_vm4 = vcmp.le.f32.partialorder %v1797_v20, %v1882_v59  ;;  %vm632_vm5 = vcmp.le.f32.partialorder %v1803_v23, %v1882_v59 }
  0xe2   : > { %vm633_vm6 = vcmp.le.f32.partialorder %v1809_v27, %v1882_v59  ;;  %vm634_vm7 = vcmp.le.f32.partialorder %v1816_v32, %v1882_v59  ;;  %vm635_vm8 = vcmp.le.f32.partialorder %v1838_v49, %v1882_v59  ;;  %vm636_vm9 = vcmp.le.f32.partialorder %v1801_v22, %v1882_v59 }
  0xe3   : > { %vm637_vm10 = vcmp.le.f32.partialorder %v1805_v24, %v1882_v59  ;;  %vm638_vm11 = vcmp.le.f32.partialorder %v1812_v29, %v1882_v59  ;;  %vm639_vm12 = vcmp.le.f32.partialorder %v1832_v43, %v1882_v59  ;;  %vm640_vm13 = vcmp.le.f32.partialorder %v1793_v18, %v1882_v59 }
  0xe4   : > { %vm641_vm14 = vcmp.le.f32.partialorder %v1799_v21, %v1882_v59  ;;  %vm642_vm15 = vcmp.le.f32.partialorder %v1807_v25, %v1882_v59  ;;  %vm643_vm0 = vcmp.le.f32.partialorder %v1814_v30, %v1882_v59  ;;  %vm644_vm1 = vcmp.le.f32.partialorder %v1836_v47, %v1882_v59 }
  0xe5   : > { %v645_v0 = vsel %vm629_vm2, %v1858_v44, 128.0  ;;  %v646_v1 = vsel %vm630_vm3, %v1860_v45, 128.0  ;;  %v647_v2 = vsel %vm631_vm4, %v1862_v46, 128.0  ;;  %v648_v3 = vsel %vm632_vm5, %v1864_v48, 128.0 }
  0xe6   : > { %v649_v4 = vsel %vm633_vm6, %v1866_v50, 128.0  ;;  %v650_v5 = vsel %vm634_vm7, %v1868_v52, 128.0  ;;  %v651_v6 = vsel %vm635_vm8, %v1870_v53, 128.0  ;;  %v652_v7 = vsel %vm636_vm9, %v1872_v54, 128.0 }
  0xe7   : > { %v653_v8 = vsel %vm637_vm10, %v1874_v55, 128.0  ;;  %v654_v9 = vsel %vm638_vm11, %v1876_v56, 128.0  ;;  %v655_v10 = vsel %vm639_vm12, %v1878_v57, 128.0  ;;  %v656_v11 = vsel %vm640_vm13, %v1880_v58, 128.0 }
  0xe8   : > { %v657_v13 = vsel %vm641_vm14, %v1884_v60, 128.0  ;;  %v658_v14 = vsel %vm642_vm15, %v1886_v61, 128.0  ;;  %v659_v15 = vsel %vm643_vm0, %v1888_v62, 128.0  ;;  %v660_v16 = vsel %vm644_vm1, %v1890_v63, 128.0 }
  0xe9   : > { %vm2974_vm2 = vcmask 130048  }
  0xea   : > { %v661_v26 = vsel %vm2974_vm2, %v645_v0, inf  ;;  %vm2975_vm3 = vmmov %vm2974_vm2 }
  0xeb   : > { %v662_v28 = vsel %vm2975_vm3, %v646_v1, inf  ;;  %vm2976_vm4 = vmmov %vm2974_vm2 }
  0xec   : > { %v663_v31 = vsel %vm2976_vm4, %v647_v2, inf  ;;  %vm2977_vm5 = vmmov %vm2974_vm2 }
  0xed   : > { %v664_v33 = vsel %vm2977_vm5, %v648_v3, inf  ;;  %vm2978_vm6 = vmmov %vm2974_vm2 }
  0xee   : > { %v665_v34 = vsel %vm2978_vm6, %v649_v4, inf  ;;  %vm2979_vm7 = vmmov %vm2974_vm2 }
  0xef   : > { %v667_v35 = vsel %vm2979_vm7, %v650_v5, inf  ;;  %vm2980_vm8 = vmmov %vm2974_vm2  ;;  %v666_v38 = vmin.f32 %v661_v26, %v665_v34 }
  0xf0   : > { %v669_v36 = vsel %vm2980_vm8, %v651_v6, inf  ;;  %vm2981_vm9 = vmmov %vm2974_vm2  ;;  %v668_v39 = vmin.f32 %v662_v28, %v667_v35 }
  0xf1   : > { %v671_v37 = vsel %vm2981_vm9, %v652_v7, inf  ;;  %v670_v40 = vmin.f32 %v663_v31, %v669_v36  ;;  %vm2982_vm1 = vmmov %vm2974_vm2 }
  0xf2   : > { %v672_v41 = vmin.f32 %v664_v33, %v671_v37  ;;  %v673_v42 = vsel %vm2982_vm1, %v653_v8, inf  ;;  %vm2983_vm10 = vmmov %vm2982_vm1 }
  0xf3   : > { %v675_v51 = vsel %vm2983_vm10, %v654_v9, inf  ;;  %vm2984_vm11 = vmmov %vm2982_vm1  ;;  %v674_v2 = vmin.f32 %v666_v38, %v673_v42 }
  0xf4   : > { %v677_v0 = vsel %vm2984_vm11, %v655_v10, inf  ;;  %vm2985_vm12 = vmmov %vm2982_vm1  ;;  %v676_v3 = vmin.f32 %v668_v39, %v675_v51  ;;  %v714_v10 = vadd.f32 %v1856_v12, %v1882_v59 }
  0xf5   : > { %v679_v1 = vsel %vm2985_vm12, %v656_v11, inf  ;;  %v678_v4 = vmin.f32 %v670_v40, %v677_v0  ;;  %vm2986_vm13 = vmmov %vm2982_vm1 }
  0xf6   : > { %v680_v5 = vmin.f32 %v672_v41, %v679_v1  ;;  %v681_v6 = vsel %vm2986_vm13, %v657_v13, inf  ;;  %vm2987_vm14 = vmmov %vm2982_vm1  ;;  %v2006_v35 = vmax.f32 %v714_v10, 0.0 }
  0xf7   : > { %v683_v7 = vsel %vm2987_vm14, %v658_v14, inf  ;;  %vm2988_vm15 = vmmov %vm2982_vm1  ;;  %v682_v31 = vmin.f32 %v674_v2, %v681_v6 }
  0xf8   : > { %v685_v26 = vsel %vm2988_vm15, %v659_v15, inf  ;;  %vm2989_vm0 = vmmov %vm2982_vm1  ;;  %v684_v8 = vmin.f32 %v676_v3, %v683_v7  ;;  %1545 = vrsqrt.f32 %v2006_v35 }
  0xf9   : > { %v687_v28 = vsel %vm2989_vm0, %v660_v16, inf  ;;  %v686_v33 = vmin.f32 %v678_v4, %v685_v26  ;;  %vm2991_vm6 = vmmov %vm2989_vm0 }
  0xfa   : > { %v688_v9 = vmin.f32 %v680_v5, %v687_v28  ;;  %v689_v11 = vmin.f32 %v682_v31, %v684_v8  ;;  %vm2992_vm7 = vmmov %vm2989_vm0 }
  0xfb   : > { %vm2994_vm1 = vmmov %vm2989_vm0 }
  0xfc   : > { %v690_v34 = vmin.f32 %v686_v33, %v688_v9 }
  0xfe   : > { %v691_v36 = vmin.f32 %v689_v11, %v690_v34  ;;  %v1546_v15 = vpop.eup %1545 }
  0xff   : > { %v717_v39 = vmul.f32 %v1546_v15, %v2006_v35 }
 0x100   : > { %v692_v13 = vrot.slane %v691_v36, 4 }
 0x101   : > { %v718_v59 = vmul.f32 %v1546_v15, %v717_v39 }
 0x102   : > { %v693_v14 = vmin.f32 %v691_v36, %v692_v13 }
 0x104   : > { %v694_v37 = vrot.slane %v693_v14, 2 }
 0x106   : > { %v695_v38 = vmin.f32 %v693_v14, %v694_v37 }
 0x108   : > { %v696_v16 = vrot.slane %v695_v38, 1 }
 0x10a   : > { %v2010_v40 = vmin.f32 %v695_v38, %v696_v16 }
 0x10c   : > { %2990 = vst [vmem:[#allocation5_spill] sm:$0xff] %v2010_v40  ;;  %vm2946_vm2 = vcmp.eq.f32.partialorder %v1862_v46, %v2010_v40  ;;  %vm2950_vm3 = vcmp.eq.f32.partialorder %v1870_v53, %v2010_v40  ;;  %vm2954_vm4 = vcmp.eq.f32.partialorder %v1878_v57, %v2010_v40  ;;  %vm2958_vm5 = vcmp.eq.f32.partialorder %v1888_v62, %v2010_v40 }
 0x10d   : > { %v2024_v41 = vsel %vm2946_vm2, 3e+38, %v1797_v20  ;;  %v2030_v42 = vsel %vm2950_vm3, 3e+38, %v1838_v49  ;;  %v2036_v51 = vsel %vm2954_vm4, 3e+38, %v1832_v43  ;;  %vm2944_vm8 = vcmp.eq.f32.partialorder %v1858_v44, %v2010_v40 }
 0x10e   : > { %v778_v0 = vsel %vm2991_vm6, %v2024_v41, inf  ;;  %v784_v1 = vsel %vm2992_vm7, %v2030_v42, inf  ;;  %v2046_v2 = vsel %vm2958_vm5, 3e+38, %v1814_v30  ;;  %vm2945_vm9 = vcmp.eq.f32.partialorder %v1860_v45, %v2010_v40 }
 0x10f   : > { %v785_v20 = vmin.f32 %v778_v0, %v784_v1  ;;  %2993 = vst [vmem:[#allocation6_spill] sm:$0xff] %v2046_v2  ;;  %v719_v43 = vmul.f32 0.5, %v718_v59  ;;  %v792_v49 = vsel %vm2994_vm1, %v2036_v51, inf  ;;  %vm2947_vm10 = vcmp.eq.f32.partialorder %v1864_v48, %v2010_v40 }
 0x110   : > { %vm2948_vm11 = vcmp.eq.f32.partialorder %v1866_v50, %v2010_v40  ;;  %vm2949_vm12 = vcmp.eq.f32.partialorder %v1868_v52, %v2010_v40  ;;  %vm2951_vm13 = vcmp.eq.f32.partialorder %v1872_v54, %v2010_v40  ;;  %vm2952_vm14 = vcmp.eq.f32.partialorder %v1874_v55, %v2010_v40 }
 0x111   : > { %v793_v30 = vmin.f32 %v785_v20, %v792_v49  ;;  %vm2953_vm15 = vcmp.eq.f32.partialorder %v1876_v56, %v2010_v40  ;;  %vm2955_vm0 = vcmp.eq.f32.partialorder %v1880_v58, %v2010_v40  ;;  %vm2956_vm6 = vcmp.eq.f32.partialorder %v1884_v60, %v2010_v40 }
 0x112   : > { %v2074_v3 = vsel %vm2944_vm8, 3e+38, %v1791_v17  ;;  %v2080_v4 = vsel %vm2945_vm9, 3e+38, %v1795_v19  ;;  %vm2957_vm7 = vcmp.eq.f32.partialorder %v1886_v61, %v2010_v40  ;;  %v2088_v5 = vsel %vm2947_vm10, 3e+38, %v1803_v23 }
 0x113   : > { %v2094_v17 = vsel %vm2948_vm11, 3e+38, %v1809_v27  ;;  %v2100_v19 = vsel %vm2949_vm12, 3e+38, %v1816_v32  ;;  %vm2959_vm1 = vcmp.eq.f32.partialorder %v1890_v63, %v2010_v40  ;;  %v2108_v23 = vsel %vm2951_vm13, 3e+38, %v1801_v22 }
 0x114   : > { %v2114_v27 = vsel %vm2952_vm14, 3e+38, %v1805_v24  ;;  %v2120_v32 = vsel %vm2953_vm15, 3e+38, %v1812_v29  ;;  %v720_v6 = vsub.f32 1.5, %v719_v43  ;;  %vm2995_vm8 = vcmask 130048  }
 0x115   : > { %v2126_v7 = vsel %vm2955_vm0, 3e+38, %v1793_v18  ;;  %v2132_v22 = vsel %vm2956_vm6, 3e+38, %v1799_v21  ;;  %v776_v24 = vsel %vm2995_vm8, %v2074_v3, inf  ;;  %vm2996_vm9 = vmmov %vm2995_vm8 }
 0x116   : > { %v777_v29 = vsel %vm2996_vm9, %v2080_v4, inf  ;;  %vm2997_vm2 = vmmov %vm2995_vm8  ;;  %v2148_v21 = vsel %vm2957_vm7, 3e+38, %v1807_v25  ;;  %v2156_v9 = vsel %vm2959_vm1, 3e+38, %v1836_v47  ;;  %v721_v16 = vmul.f32 %v1546_v15, %v720_v6 }
 0x117   : > { %v779_v26 = vsel %vm2997_vm2, %v2088_v5, inf  ;;  %vm2998_vm10 = vmmov %vm2997_vm2  ;;  %3001 = vst [vmem:[#allocation7_spill] sm:$0xff] %v2156_v9  ;;  %v788_v11 = vsel %vm2997_vm2, %v2114_v27, inf  ;;  %v802_v59 = vsel %vm2997_vm2, %v2156_v9, inf  ;;  %v726_v6 = vand.u32 2147483648, %v2006_v35 }
 0x118   : > { %v780_v28 = vsel %vm2998_vm10, %v2094_v17, inf  ;;  %vm2999_vm11 = vmmov %vm2997_vm2 }
 0x119   : > { %v782_v18 = vsel %vm2999_vm11, %v2100_v19, inf  ;;  %v781_v31 = vmin.f32 %v776_v24, %v780_v28  ;;  %vm3000_vm8 = vmmov %vm2997_vm2  ;;  %v722_v24 = vmul.f32 %v721_v16, %v2006_v35 }
 0x11a   : > { %v783_v8 = vmin.f32 %v777_v29, %v782_v18  ;;  %v786_v33 = vsel %vm3000_vm8, %v2108_v23, inf  ;;  %vm3002_vm9 = vmmov %vm2997_vm2 }
 0x11b   : > { %v787_v10 = vmin.f32 %v779_v26, %v786_v33  ;;  %v790_v34 = vsel %vm3002_vm9, %v2120_v32, inf  ;;  %vm3003_vm10 = vmmov %vm2997_vm2  ;;  %v789_v36 = vmin.f32 %v781_v31, %v788_v11  ;;  %vm723_vm9 = vcmp.eq.f32.partialorder %v2006_v35, inf }
 0x11c   : > { %v800_v25 = vsel %vm3003_vm10, %v2046_v2, inf  ;;  %v791_v13 = vmin.f32 %v783_v8, %v790_v34  ;;  %vm3004_vm11 = vmmov %vm2997_vm2 }
 0x11d   : > { %v794_v14 = vsel %vm3004_vm11, %v2126_v7, inf  ;;  %v801_v37 = vmin.f32 %v793_v30, %v800_v25  ;;  %vm3005_vm8 = vmmov %vm2997_vm2  ;;  %v724_v30 = vsel %vm723_vm9, %v2006_v35, %v722_v24 }
 0x11e   : > { %v795_v38 = vmin.f32 %v787_v10, %v794_v14  ;;  %v796_v47 = vsel %vm3005_vm8, %v2132_v22, inf  ;;  %vm3006_vm12 = vmmov %vm2997_vm2 }
 0x11f   : > { %v798_v39 = vsel %vm3006_vm12, %v2148_v21, inf  ;;  %v797_v0 = vmin.f32 %v789_v36, %v796_v47  ;;  %vm725_vm12 = vcmp.eq.f32.partialorder %v2006_v35, 0.0 }
 0x120   : > { %v799_v1 = vmin.f32 %v791_v13, %v798_v39  ;;  %v803_v20 = vmin.f32 %v795_v38, %v802_v59  ;;  %v727_v28 = vsel %vm725_vm12, %v726_v6, %v724_v30 }
 0x121   : > { %v2177_v8 = vadd.f32 1e-08, %v727_v28 }
 0x122   : > { %v804_v43 = vmin.f32 %v797_v0, %v799_v1  ;;  %v805_v49 = vmin.f32 %v801_v37, %v803_v20 }
 0x123   : > { %1547 = vrcp.f32 %v2177_v8 }
 0x124   : > { %v806_v29 = vmin.f32 %v804_v43, %v805_v49 }
 0x126   : > { %v807_v15 = vrot.slane %v806_v29, 4 }
 0x128   : > { %v808_v26 = vmin.f32 %v806_v29, %v807_v15 }
 0x129   : > { %v2230_v36 = vpop.eup %1547 }
 0x12a   : > { %v809_v18 = vrot.slane %v808_v26, 2 }
 0x12c   : > { %v810_v31 = vmin.f32 %v808_v26, %v809_v18 }
 0x12e   : > { %v811_v33 = vrot.slane %v810_v31, 1 }
 0x130   : > { %v2179_v10 = vmin.f32 %v810_v31, %v811_v33 }
 0x132   : > { %vm813_vm10 = vcmp.le.f32.partialorder %v2074_v3, %v2179_v10  ;;  %vm814_vm11 = vcmp.le.f32.partialorder %v2080_v4, %v2179_v10  ;;  %vm815_vm8 = vcmp.le.f32.partialorder %v2024_v41, %v2179_v10  ;;  %vm816_vm2 = vcmp.le.f32.partialorder %v2088_v5, %v2179_v10 }
 0x133   : > { %vm817_vm9 = vcmp.le.f32.partialorder %v2094_v17, %v2179_v10  ;;  %vm818_vm12 = vcmp.le.f32.partialorder %v2100_v19, %v2179_v10  ;;  %vm819_vm3 = vcmp.le.f32.partialorder %v2030_v42, %v2179_v10  ;;  %vm820_vm13 = vcmp.le.f32.partialorder %v2108_v23, %v2179_v10 }
 0x134   : > { %vm821_vm14 = vcmp.le.f32.partialorder %v2114_v27, %v2179_v10  ;;  %vm822_vm15 = vcmp.le.f32.partialorder %v2120_v32, %v2179_v10  ;;  %vm823_vm4 = vcmp.le.f32.partialorder %v2036_v51, %v2179_v10  ;;  %vm824_vm0 = vcmp.le.f32.partialorder %v2126_v7, %v2179_v10 }
 0x135   : > { %vm825_vm6 = vcmp.le.f32.partialorder %v2132_v22, %v2179_v10  ;;  %vm826_vm7 = vcmp.le.f32.partialorder %v2148_v21, %v2179_v10  ;;  %vm827_vm5 = vcmp.le.f32.partialorder %v2046_v2, %v2179_v10  ;;  %vm828_vm1 = vcmp.le.f32.partialorder %v2156_v9, %v2179_v10 }
 0x136   : > { %v829_v35 = vsel %vm813_vm10, %v1858_v44, 128.0  ;;  %v830_v11 = vsel %vm814_vm11, %v1860_v45, 128.0  ;;  %v831_v34 = vsel %vm815_vm8, %v1862_v46, 128.0  ;;  %v832_v25 = vsel %vm816_vm2, %v1864_v48, 128.0 }
 0x137   : > { %v833_v13 = vsel %vm817_vm9, %v1866_v50, 128.0  ;;  %v834_v14 = vsel %vm818_vm12, %v1868_v52, 128.0  ;;  %v835_v37 = vsel %vm819_vm3, %v1870_v53, 128.0  ;;  %v836_v38 = vsel %vm820_vm13, %v1872_v54, 128.0 }
 0x138   : > { %v837_v16 = vsel %vm821_vm14, %v1874_v55, 128.0  ;;  %v838_v47 = vsel %vm822_vm15, %v1876_v56, 128.0  ;;  %v839_v39 = vsel %vm823_vm4, %v1878_v57, 128.0  ;;  %v840_v59 = vsel %vm824_vm0, %v1880_v58, 128.0 }
 0x139   : > { %v841_v0 = vsel %vm825_vm6, %v1884_v60, 128.0  ;;  %v842_v1 = vsel %vm826_vm7, %v1886_v61, 128.0  ;;  %v843_v20 = vsel %vm827_vm5, %v1888_v62, 128.0  ;;  %v844_v43 = vsel %vm828_vm1, %v1890_v63, 128.0 }
 0x13a   : > { %vm3007_vm3 = vcmask 130048  }
 0x13b   : > { %v845_v49 = vsel %vm3007_vm3, %v829_v35, inf  ;;  %vm3008_vm4 = vmmov %vm3007_vm3 }
 0x13c   : > { %v846_v24 = vsel %vm3008_vm4, %v830_v11, inf  ;;  %vm3009_vm13 = vmmov %vm3007_vm3 }
 0x13d   : > { %v847_v29 = vsel %vm3009_vm13, %v831_v34, inf  ;;  %vm3010_vm14 = vmmov %vm3007_vm3 }
 0x13e   : > { %v848_v15 = vsel %vm3010_vm14, %v832_v25, inf  ;;  %vm3011_vm15 = vmmov %vm3007_vm3 }
 0x13f   : > { %v849_v30 = vsel %vm3011_vm15, %v833_v13, inf  ;;  %vm3012_vm0 = vmmov %vm3007_vm3 }
 0x140   : > { %v851_v6 = vsel %vm3012_vm0, %v834_v14, inf  ;;  %vm3013_vm6 = vmmov %vm3012_vm0  ;;  %v850_v18 = vmin.f32 %v845_v49, %v849_v30 }
 0x141   : > { %v853_v26 = vsel %vm3013_vm6, %v835_v37, inf  ;;  %vm3014_vm5 = vmmov %vm3012_vm0  ;;  %v852_v31 = vmin.f32 %v846_v24, %v851_v6 }
 0x142   : > { %v855_v28 = vsel %vm3014_vm5, %v836_v38, inf  ;;  %v854_v33 = vmin.f32 %v847_v29, %v853_v26  ;;  %vm3015_vm7 = vmmov %vm3012_vm0 }
 0x143   : > { %v856_v40 = vmin.f32 %v848_v15, %v855_v28  ;;  %v857_v35 = vsel %vm3015_vm7, %v837_v16, inf  ;;  %vm3016_vm1 = vmmov %vm3012_vm0 }
 0x144   : > { %v859_v11 = vsel %vm3016_vm1, %v838_v47, inf  ;;  %vm3017_vm10 = vmmov %vm3012_vm0  ;;  %v858_v9 = vmin.f32 %v850_v18, %v857_v35 }
 0x145   : > { %v861_v34 = vsel %vm3017_vm10, %v839_v39, inf  ;;  %vm3018_vm11 = vmmov %vm3012_vm0  ;;  %v860_v13 = vmin.f32 %v852_v31, %v859_v11  ;;  %v898_v39 = vadd.f32 %v1856_v12, %v2179_v10  ;;  %v740_v11 = vand.u32 2147483648, %v2177_v8 }
 0x146   : > { %v863_v25 = vsel %vm3018_vm11, %v840_v59, inf  ;;  %v862_v2 = vmin.f32 %v854_v33, %v861_v34  ;;  %vm3019_vm8 = vmmov %vm3012_vm0 }
 0x147   : > { %v864_v14 = vmin.f32 %v856_v40, %v863_v25  ;;  %v865_v37 = vsel %vm3019_vm8, %v841_v0, inf  ;;  %vm3020_vm2 = vmmov %vm3012_vm0  ;;  %v899_v6 = vmax.f32 %v898_v39, 0.0  ;;  %v730_v40 = vmul.f32 %v2230_v36, %v2177_v8 }
 0x148   : > { %v867_v38 = vsel %vm3020_vm2, %v842_v1, inf  ;;  %vm3021_vm9 = vmmov %vm3012_vm0  ;;  %v866_v29 = vmin.f32 %v858_v9, %v865_v37 }
 0x149   : > { %v869_v49 = vsel %vm3021_vm9, %v843_v20, inf  ;;  %vm3022_vm12 = vmmov %vm3012_vm0  ;;  %v868_v16 = vmin.f32 %v860_v13, %v867_v38  ;;  %1549 = vrsqrt.f32 %v899_v6  ;;  %v731_v20 = vsub.f32 1.0, %v730_v40 }
 0x14a   : > { %v871_v24 = vsel %vm3022_vm12, %v844_v43, inf  ;;  %v870_v15 = vmin.f32 %v862_v2, %v869_v49  ;;  %vm907_vm13 = vcmp.eq.f32.partialorder %v899_v6, inf  ;;  %v910_v25 = vand.u32 2147483648, %v899_v6 }
 0x14b   : > { %v872_v47 = vmin.f32 %v864_v14, %v871_v24  ;;  %v873_v59 = vmin.f32 %v866_v29, %v868_v16  ;;  %v732_v2 = vmul.f32 %v2230_v36, %v731_v20  ;;  %vm735_vm9 = vweird.f32 %v2230_v36 }
 0x14d   : > { %v874_v30 = vmin.f32 %v870_v15, %v872_v47  ;;  %v2304_v35 = vadd.f32 %v2230_v36, %v732_v2 }
 0x14f   : > { %v875_v26 = vmin.f32 %v873_v59, %v874_v30  ;;  %v1550_v43 = vpop.eup %1549 }
 0x150   : > { %v901_v18 = vmul.f32 %v1550_v43, %v899_v6 }
 0x151   : > { %v876_v0 = vrot.slane %v875_v26, 4 }
 0x152   : > { %v902_v33 = vmul.f32 %v1550_v43, %v901_v18 }
 0x153   : > { %v877_v1 = vmin.f32 %v875_v26, %v876_v0 }
 0x154   : > { %v903_v34 = vmul.f32 0.5, %v902_v33 }
 0x155   : > { %v878_v28 = vrot.slane %v877_v1, 2 }
 0x156   : > { %v904_v13 = vsub.f32 1.5, %v903_v34 }
 0x157   : > { %v879_v9 = vmin.f32 %v877_v1, %v878_v28 }
 0x158   : > { %v905_v38 = vmul.f32 %v1550_v43, %v904_v13  ;;  %v3034_v43 = vld [vmem:[#allocation7_spill] sm:$0xff] }
 0x159   : > { %v880_v31 = vrot.slane %v879_v9, 1 }
 0x15a   : > { %v906_v24 = vmul.f32 %v905_v38, %v899_v6  ;;  %v738_v38 = vand.u32 2147483647, %v2177_v8 }
 0x15b   : > { %v2301_v10 = vmin.f32 %v879_v9, %v880_v31 }
 0x15d   : > { %vm2964_vm3 = vcmp.eq.f32.partialorder %v1858_v44, %v2301_v10  ;;  %vm2965_vm4 = vcmp.eq.f32.partialorder %v1860_v45, %v2301_v10  ;;  %vm2966_vm14 = vcmp.eq.f32.partialorder %v1862_v46, %v2301_v10  ;;  %vm2967_vm15 = vcmp.eq.f32.partialorder %v1864_v48, %v2301_v10 }
 0x15e   : > { %vm2968_vm0 = vcmp.eq.f32.partialorder %v1866_v50, %v2301_v10  ;;  %vm2969_vm6 = vcmp.eq.f32.partialorder %v1868_v52, %v2301_v10  ;;  %vm2970_vm7 = vcmp.eq.f32.partialorder %v1870_v53, %v2301_v10  ;;  %vm2971_vm1 = vcmp.eq.f32.partialorder %v1872_v54, %v2301_v10 }
 0x15f   : > { %vm890_vm10 = vcmp.eq.f32.partialorder %v1874_v55, %v2301_v10  ;;  %vm891_vm11 = vcmp.eq.f32.partialorder %v1876_v56, %v2301_v10  ;;  %vm892_vm8 = vcmp.eq.f32.partialorder %v1878_v57, %v2301_v10  ;;  %vm893_vm2 = vcmp.eq.f32.partialorder %v1880_v58, %v2301_v10 }
 0x160   : > { %vm895_vm12 = vcmp.eq.f32.partialorder %v1886_v61, %v2301_v10  ;;  %vm896_vm5 = vcmp.eq.f32.partialorder %v1888_v62, %v2301_v10  ;;  %v2341_v14 = vsel %vm2964_vm3, 3e+38, %v2074_v3  ;;  %v2347_v37 = vsel %vm2968_vm0, 3e+38, %v2094_v17 }
 0x161   : > { %v2354_v49 = vsel %vm2965_vm4, 3e+38, %v2080_v4  ;;  %v2360_v3 = vsel %vm2966_vm14, 3e+38, %v2024_v41  ;;  %v2366_v17 = vsel %vm2971_vm1, 3e+38, %v2108_v23  ;;  %vm897_vm3 = vcmp.eq.f32.partialorder %v1890_v63, %v2301_v10 }
 0x162   : > { %v2374_v4 = vsel %vm2967_vm15, 3e+38, %v2088_v5  ;;  %v2380_v41 = vsel %vm2969_vm6, 3e+38, %v2100_v19  ;;  %v2386_v23 = vsel %vm890_vm10, 3e+38, %v2114_v27 }
 0x163   : > { %v2392_v29 = vsel %vm2970_vm7, 3e+38, %v2030_v42  ;;  %v2398_v5 = vsel %vm891_vm11, 3e+38, %v2120_v32  ;;  %v2404_v19 = vsel %vm895_vm12, 3e+38, %v2148_v21  ;;  %v908_v21 = vsel %vm907_vm13, %v899_v6, %v906_v24 }
 0x164   : > { %v2410_v27 = vsel %vm892_vm8, 3e+38, %v2036_v51  ;;  %v2416_v42 = vsel %vm893_vm2, 3e+38, %v2126_v7  ;;  %vm3023_vm4 = vcmask 130048   ;;  %vm3028_vm7 = vcmp.eq.f32.partialorder %v899_v6, 0.0 }
 0x165   : > { %v977_v32 = vsel %vm3023_vm4, %v2341_v14, inf  ;;  %vm3024_vm14 = vmmov %vm3023_vm4  ;;  %v911_v7 = vsel %vm3028_vm7, %v910_v25, %v908_v21  ;;  %v3033_v6 = vld [vmem:[#allocation6_spill] sm:$0xff]  ;;  %v2452_v9 = vsel %vm897_vm3, 3e+38, %v3034_v43 }
 0x166   : > { %v978_v16 = vsel %vm3024_vm14, %v2354_v49, inf  ;;  %vm3025_vm15 = vmmov %vm3023_vm4  ;;  %v912_v26 = vadd.f32 1e-08, %v911_v7  ;;  %vm3032_vm14 = vcmp.eq.f32.partialorder %v1884_v60, %v2301_v10  ;;  %v2446_v28 = vsel %vm896_vm5, 3e+38, %v3033_v6 }
 0x167   : > { %v979_v15 = vsel %vm3025_vm15, %v2360_v3, inf  ;;  %vm3026_vm0 = vmmov %vm3023_vm4  ;;  %v2440_v20 = vsel %vm3032_vm14, 3e+38, %v2132_v22 }
 0x168   : > { %v980_v51 = vsel %vm3026_vm0, %v2374_v4, inf  ;;  %vm3027_vm6 = vmmov %vm3026_vm0  ;;  %1551 = vrcp.f32 %v912_v26  ;;  %v991_v22 = vsel %vm3026_vm0, %v2398_v5, inf }
 0x169   : > { %v981_v47 = vsel %vm3027_vm6, %v2347_v37, inf  ;;  %vm3029_vm1 = vmmov %vm3026_vm0 }
 0x16a   : > { %v982_v39 = vmin.f32 %v977_v32, %v981_v47  ;;  %v983_v59 = vsel %vm3029_vm1, %v2380_v41, inf  ;;  %vm3030_vm4 = vmmov %vm3026_vm0  ;;  %vm734_vm1 = vweird.f32 %v2177_v8 }
 0x16b   : > { %v985_v30 = vsel %vm3030_vm4, %v2392_v29, inf  ;;  %v984_v40 = vmin.f32 %v978_v16, %v983_v59  ;;  %vm3031_vm13 = vmmov %vm3026_vm0 }
 0x16c   : > { %v986_v0 = vmin.f32 %v979_v15, %v985_v30  ;;  %v987_v1 = vsel %vm3031_vm13, %v2366_v17, inf  ;;  %vm3035_vm15 = vmmov %vm3026_vm0  ;;  %v741_v30 = vor.u32 1.1754944e-38, %v740_v11 }
 0x16d   : > { %v988_v18 = vmin.f32 %v980_v51, %v987_v1  ;;  %v989_v2 = vsel %vm3035_vm15, %v2386_v23, inf  ;;  %vm3036_vm6 = vmmov %vm3026_vm0  ;;  %v992_v34 = vmin.f32 %v984_v40, %v991_v22  ;;  %v1003_v51 = vsel %vm3026_vm0, %v2452_v9, inf  ;;  %v3041_v22 = vld [vmem:[#allocation5_spill] sm:$0xff] }
 0x16e   : > { %v993_v31 = vsel %vm3036_vm6, %v2410_v27, inf  ;;  %v990_v33 = vmin.f32 %v982_v39, %v989_v2  ;;  %vm3037_vm7 = vmmov %vm3026_vm0  ;;  %v1552_v40 = vpop.eup %1551  ;;  %vm3042_vm6 = vcmp.eq.f32.partialorder %v1890_v63, %v3041_v22 }
 0x16f   : > { %v994_v25 = vmin.f32 %v986_v0, %v993_v31  ;;  %v995_v13 = vsel %vm3037_vm7, %v2416_v42, inf  ;;  %vm3038_vm4 = vmmov %vm3026_vm0  ;;  %v914_v43 = vmul.f32 %v1552_v40, %v912_v26  ;;  %vm3043_vm7 = vcmp.eq.f32.partialorder %v1888_v62, %v3041_v22 }
 0x170   : > { %v996_v24 = vmin.f32 %v988_v18, %v995_v13  ;;  %v997_v32 = vsel %vm3038_vm4, %v2440_v20, inf  ;;  %vm736_vm13 = vmor %vm734_vm1, %vm735_vm9  ;;  %vm739_vm9 = vcmp.eq.f32.partialorder %v738_v38, 8.507059e+37  ;;  %vm919_vm1 = vweird.f32 %v1552_v40 }
 0x171   : > { %v998_v16 = vmin.f32 %v990_v33, %v997_v32  ;;  %vm3039_vm14 = vmmov %vm3026_vm0  ;;  %v737_v47 = vsel %vm736_vm13, %v2230_v36, %v2304_v35  ;;  %v915_v2 = vsub.f32 1.0, %v914_v43  ;;  %v924_v35 = vand.u32 2147483648, %v912_v26 }
 0x172   : > { %v999_v21 = vsel %vm3039_vm14, %v2404_v19, inf  ;;  %vm3040_vm15 = vmmov %vm3026_vm0  ;;  %v1004_v59 = vmin.f32 %v996_v24, %v1003_v51  ;;  %v2478_v6 = vsel %vm739_vm9, %v741_v30, %v737_v47  ;;  %v922_v33 = vand.u32 2147483647, %v912_v26 }
 0x173   : > { %v1001_v15 = vsel %vm3040_vm15, %v2446_v28, inf  ;;  %v1000_v7 = vmin.f32 %v992_v34, %v999_v21  ;;  %v759_v36 = vsel %vm3042_vm6, %v2478_v6, 0.0  ;;  %v758_v8 = vsel %vm3043_vm7, %v2478_v6, 0.0 }
 0x174   : > { %v1002_v39 = vmin.f32 %v994_v25, %v1001_v15  ;;  %v916_v11 = vmul.f32 %v1552_v40, %v915_v2  ;;  %vm3044_vm4 = vcmp.eq.f32.partialorder %v1886_v61, %v3041_v22  ;;  %vm3045_vm13 = vcmp.eq.f32.partialorder %v1884_v60, %v3041_v22 }
 0x175   : > { %v1005_v0 = vmin.f32 %v998_v16, %v1000_v7  ;;  %v757_v34 = vsel %vm3044_vm4, %v2478_v6, 0.0  ;;  %v756_v13 = vsel %vm3045_vm13, %v2478_v6, 0.0  ;;  %vm3046_vm14 = vcmp.eq.f32.partialorder %v1880_v58, %v3041_v22 }
 0x176   : > { %v1006_v1 = vmin.f32 %v1002_v39, %v1004_v59  ;;  %v755_v38 = vsel %vm3046_vm14, %v2478_v6, 0.0  ;;  %vm3047_vm15 = vcmp.eq.f32.partialorder %v1878_v57, %v3041_v22  ;;  %v917_v32 = vadd.f32 %v1552_v40, %v916_v11 }
 0x177   : > { %v754_v24 = vsel %vm3047_vm15, %v2478_v6, 0.0  ;;  %vm918_vm0 = vweird.f32 %v912_v26  ;;  %vm3048_vm9 = vcmp.eq.f32.partialorder %v1876_v56, %v3041_v22  ;;  %vm3049_vm6 = vcmp.eq.f32.partialorder %v1874_v55, %v3041_v22 }
 0x178   : > { %v1007_v18 = vmin.f32 %v1005_v0, %v1006_v1  ;;  %v753_v16 = vsel %vm3048_vm9, %v2478_v6, 0.0  ;;  %v2512_v21 = vsel %vm3049_vm6, %v2478_v6, 0.0  ;;  %vm920_vm7 = vmor %vm918_vm0, %vm919_vm1  ;;  %v925_v15 = vor.u32 1.1754944e-38, %v924_v35 }
 0x179   : > { %vm3050_vm4 = vcmp.eq.f32.partialorder %v1872_v54, %v3041_v22  ;;  %vm3051_vm13 = vcmp.eq.f32.partialorder %v1870_v53, %v3041_v22  ;;  %v921_v7 = vsel %vm920_vm7, %v1552_v40, %v917_v32  ;;  %vm923_vm14 = vcmp.eq.f32.partialorder %v922_v33, 8.507059e+37 }
 0x17a   : > { %v1008_v31 = vrot.slane %v1007_v18, 4  ;;  %v2518_v47 = vsel %vm3050_vm4, %v2478_v6, 0.0  ;;  %v2524_v26 = vsel %vm3051_vm13, %v2478_v6, 0.0  ;;  %vm3052_vm1 = vcmp.eq.f32.partialorder %v1868_v52, %v3041_v22 }
 0x17b   : > { %v2530_v39 = vsel %vm3052_vm1, %v2478_v6, 0.0  ;;  %vm3053_vm15 = vcmp.eq.f32.partialorder %v1866_v50, %v3041_v22  ;;  %v2538_v30 = vsel %vm923_vm14, %v925_v15, %v921_v7  ;;  %vm3054_vm0 = vcmp.eq.f32.partialorder %v1864_v48, %v3041_v22 }
 0x17c   : > { %v1009_v25 = vmin.f32 %v1007_v18, %v1008_v31  ;;  %v2536_v59 = vsel %vm3053_vm15, %v2478_v6, 0.0  ;;  %v2544_v40 = vsel %vm3054_vm0, %v2478_v6, 0.0  ;;  %vm3055_vm9 = vcmp.eq.f32.partialorder %v1862_v46, %v3041_v22 }
 0x17d   : > { %v2550_v1 = vsel %vm3055_vm9, %v2478_v6, 0.0  ;;  %v943_v43 = vsel %vm897_vm3, %v2538_v30, 0.0  ;;  %v942_v18 = vsel %vm896_vm5, %v2538_v30, 0.0  ;;  %v941_v2 = vsel %vm895_vm12, %v2538_v30, 0.0 }
 0x17e   : > { %v1010_v51 = vrot.slane %v1009_v25, 2  ;;  %vm3056_vm6 = vcmp.eq.f32.partialorder %v1884_v60, %v2301_v10  ;;  %v2568_v31 = vadd.f32 %v943_v43, %v759_v36  ;;  %v2570_v33 = vadd.f32 %v942_v18, %v758_v8 }
 0x17f   : > { %v940_v35 = vsel %vm3056_vm6, %v2538_v30, 0.0  ;;  %v939_v15 = vsel %vm893_vm2, %v2538_v30, 0.0  ;;  %v937_v36 = vsel %vm891_vm11, %v2538_v30, 0.0  ;;  %v2600_v43 = vsel %vm890_vm10, %v2538_v30, 0.0 }
 0x180   : > { %v1011_v0 = vmin.f32 %v1009_v25, %v1010_v51  ;;  %3057 = vst [vmem:[#allocation6_spill] sm:$0xff] %v2570_v33  ;;  %v2572_v25 = vadd.f32 %v941_v2, %v757_v34  ;;  %v2574_v32 = vadd.f32 %v940_v35, %v756_v13  ;;  %v938_v51 = vsel %vm892_vm8, %v2538_v30, 0.0 }
 0x181   : > { %v2590_v34 = vadd.f32 %v939_v15, %v755_v38  ;;  %v2592_v13 = vadd.f32 %v938_v51, %v754_v24  ;;  %v2594_v7 = vadd.f32 %v937_v36, %v753_v16  ;;  %vm3063_vm3 = vcmp.eq.f32.partialorder %v1872_v54, %v2301_v10 }
 0x182   : > { %v1012_v11 = vrot.slane %v1011_v0, 1  ;;  %3058 = vst [vmem:[#allocation7_spill] sm:$0xff] %v2572_v25  ;;  %v2606_v18 = vsel %vm3063_vm3, %v2538_v30, 0.0  ;;  %vm3064_vm5 = vcmp.eq.f32.partialorder %v1870_v53, %v2301_v10  ;;  %vm3065_vm11 = vcmp.eq.f32.partialorder %v1868_v52, %v2301_v10 }
 0x183   : > { %3059 = vst [vmem:[#allocation5_spill] sm:$0xff] %v2574_v32  ;;  %v2612_v38 = vsel %vm3064_vm5, %v2538_v30, 0.0  ;;  %v2618_v24 = vsel %vm3065_vm11, %v2538_v30, 0.0 }
 0x184   : > { %v2588_v8 = vmin.f32 %v1011_v0, %v1012_v11  ;;  %3060 = vst [vmem:[#allocation8_spill] sm:$0xff] %v2590_v34 }
 0x185   : > { %3061 = vst [vmem:[#allocation9_spill] sm:$0xff] %v2592_v13 }
 0x186   : > { %3062 = vst [vmem:[#allocation10_spill] sm:$0xff] %v2594_v7  ;;  %vm1014_vm10 = vcmp.le.f32.partialorder %v2341_v14, %v2588_v8  ;;  %vm1015_vm8 = vcmp.le.f32.partialorder %v2354_v49, %v2588_v8  ;;  %vm1016_vm2 = vcmp.le.f32.partialorder %v2360_v3, %v2588_v8  ;;  %vm1017_vm12 = vcmp.le.f32.partialorder %v2374_v4, %v2588_v8 }
 0x187   : > { %vm1018_vm7 = vcmp.le.f32.partialorder %v2347_v37, %v2588_v8  ;;  %vm1019_vm4 = vcmp.le.f32.partialorder %v2380_v41, %v2588_v8  ;;  %vm1020_vm13 = vcmp.le.f32.partialorder %v2392_v29, %v2588_v8  ;;  %vm1021_vm14 = vcmp.le.f32.partialorder %v2366_v17, %v2588_v8 }
 0x188   : > { %vm1022_vm1 = vcmp.le.f32.partialorder %v2386_v23, %v2588_v8  ;;  %vm1023_vm15 = vcmp.le.f32.partialorder %v2398_v5, %v2588_v8  ;;  %vm1024_vm0 = vcmp.le.f32.partialorder %v2410_v27, %v2588_v8  ;;  %vm1025_vm9 = vcmp.le.f32.partialorder %v2416_v42, %v2588_v8 }
 0x189   : > { %vm1026_vm6 = vcmp.le.f32.partialorder %v2440_v20, %v2588_v8  ;;  %vm1027_vm3 = vcmp.le.f32.partialorder %v2404_v19, %v2588_v8  ;;  %vm1028_vm5 = vcmp.le.f32.partialorder %v2446_v28, %v2588_v8  ;;  %vm1029_vm11 = vcmp.le.f32.partialorder %v2452_v9, %v2588_v8 }
 0x18a   : > { %v1030_v16 = vsel %vm1014_vm10, %v1858_v44, 128.0  ;;  %v1031_v0 = vsel %vm1015_vm8, %v1860_v45, 128.0  ;;  %v1032_v2 = vsel %vm1016_vm2, %v1862_v46, 128.0  ;;  %v1033_v35 = vsel %vm1017_vm12, %v1864_v48, 128.0 }
 0x18b   : > { %v1034_v14 = vsel %vm1018_vm7, %v1866_v50, 128.0  ;;  %v1035_v49 = vsel %vm1019_vm4, %v1868_v52, 128.0  ;;  %v1036_v3 = vsel %vm1020_vm13, %v1870_v53, 128.0  ;;  %v1037_v4 = vsel %vm1021_vm14, %v1872_v54, 128.0 }
 0x18c   : > { %v1038_v37 = vsel %vm1022_vm1, %v1874_v55, 128.0  ;;  %v1039_v41 = vsel %vm1023_vm15, %v1876_v56, 128.0  ;;  %v1040_v29 = vsel %vm1024_vm0, %v1878_v57, 128.0  ;;  %v1041_v17 = vsel %vm1025_vm9, %v1880_v58, 128.0 }
 0x18d   : > { %v1042_v23 = vsel %vm1026_vm6, %v1884_v60, 128.0  ;;  %v1043_v5 = vsel %vm1027_vm3, %v1886_v61, 128.0  ;;  %v1044_v27 = vsel %vm1028_vm5, %v1888_v62, 128.0  ;;  %v1045_v42 = vsel %vm1029_vm11, %v1890_v63, 128.0 }
 0x18e   : > { %vm3066_vm10 = vcmask 130048  }
 0x18f   : > { %v1046_v11 = vsel %vm3066_vm10, %v1030_v16, inf  ;;  %vm3067_vm8 = vmmov %vm3066_vm10  ;;  %vm3082_vm10 = vcmp.eq.f32.partialorder %v1866_v50, %v2301_v10 }
 0x190   : > { %v1047_v20 = vsel %vm3067_vm8, %v1031_v0, inf  ;;  %vm3068_vm2 = vmmov %vm3067_vm8  ;;  %vm3083_vm8 = vcmp.eq.f32.partialorder %v1864_v48, %v2301_v10 }
 0x191   : > { %v1048_v15 = vsel %vm3068_vm2, %v1032_v2, inf  ;;  %vm3069_vm12 = vmmov %vm3068_vm2 }
 0x192   : > { %v1049_v51 = vsel %vm3069_vm12, %v1033_v35, inf  ;;  %vm3070_vm7 = vmmov %vm3068_vm2  ;;  %vm3085_vm12 = vcmp.eq.f32.partialorder %v1860_v45, %v2301_v10 }
 0x193   : > { %v1050_v19 = vsel %vm3070_vm7, %v1034_v14, inf  ;;  %vm3071_vm4 = vmmov %vm3068_vm2  ;;  %vm3086_vm7 = vcmp.eq.f32.partialorder %v1860_v45, %v3041_v22 }
 0x194   : > { %v1052_v36 = vsel %vm3071_vm4, %v1035_v49, inf  ;;  %vm3072_vm13 = vmmov %vm3068_vm2  ;;  %v1051_v13 = vmin.f32 %v1046_v11, %v1050_v19  ;;  %vm3087_vm4 = vcmp.eq.f32.partialorder %v1858_v44, %v3041_v22 }
 0x195   : > { %v1054_v28 = vsel %vm3072_vm13, %v1036_v3, inf  ;;  %vm3073_vm14 = vmmov %vm3068_vm2  ;;  %v1053_v34 = vmin.f32 %v1047_v20, %v1052_v36  ;;  %vm3088_vm13 = vcmp.eq.f32.partialorder %v1858_v44, %v2301_v10 }
 0x196   : > { %v1056_v7 = vsel %vm3073_vm14, %v1037_v4, inf  ;;  %v1055_v9 = vmin.f32 %v1048_v15, %v1054_v28  ;;  %vm3074_vm1 = vmmov %vm3068_vm2  ;;  %vm3084_vm2 = vcmp.eq.f32.partialorder %v1862_v46, %v2301_v10 }
 0x197   : > { %v1057_v32 = vmin.f32 %v1049_v51, %v1056_v7  ;;  %v1058_v16 = vsel %vm3074_vm1, %v1038_v37, inf  ;;  %vm3075_vm15 = vmmov %vm3074_vm1 }
 0x198   : > { %v1060_v0 = vsel %vm3075_vm15, %v1039_v41, inf  ;;  %vm3076_vm0 = vmmov %vm3074_vm1  ;;  %v1059_v25 = vmin.f32 %v1051_v13, %v1058_v16  ;;  %v2744_v13 = vadd.f32 %v2612_v38, %v2524_v26  ;;  %v930_v26 = vsel %vm3084_vm2, %v2538_v30, 0.0 }
 0x199   : > { %v1062_v2 = vsel %vm3076_vm0, %v1040_v29, inf  ;;  %vm3077_vm9 = vmmov %vm3076_vm0  ;;  %v1061_v14 = vmin.f32 %v1053_v34, %v1060_v0  ;;  %v1099_v29 = vadd.f32 %v1856_v12, %v2588_v8  ;;  %v2736_v34 = vadd.f32 %v2600_v43, %v2512_v21 }
 0x19a   : > { %v1064_v35 = vsel %vm3077_vm9, %v1041_v17, inf  ;;  %v1063_v33 = vmin.f32 %v1055_v9, %v1062_v2  ;;  %vm3078_vm6 = vmmov %vm3076_vm0  ;;  %v932_v12 = vsel %vm3082_vm10, %v2538_v30, 0.0  ;;  %v745_v38 = vsel %vm3086_vm7, %v2478_v6, 0.0 }
 0x19b   : > { %v1065_v49 = vmin.f32 %v1057_v32, %v1064_v35  ;;  %v1066_v3 = vsel %vm3078_vm6, %v1042_v23, inf  ;;  %vm3079_vm3 = vmmov %vm3076_vm0  ;;  %v2740_v32 = vadd.f32 %v2606_v18, %v2518_v47  ;;  %v1100_v21 = vmax.f32 %v1099_v29, 0.0 }
 0x19c   : > { %v1068_v4 = vsel %vm3079_vm3, %v1043_v5, inf  ;;  %vm3080_vm5 = vmmov %vm3076_vm0  ;;  %v1067_v20 = vmin.f32 %v1059_v25, %v1066_v3  ;;  %v2755_v8 = vadd.f32 %v932_v12, %v2536_v59  ;;  %v931_v47 = vsel %vm3083_vm8, %v2538_v30, 0.0 }
 0x19d   : > { %v1070_v11 = vsel %vm3080_vm5, %v1044_v27, inf  ;;  %vm3081_vm11 = vmmov %vm3076_vm0  ;;  %v1069_v37 = vmin.f32 %v1061_v14, %v1068_v4  ;;  %v2766_v43 = vadd.f32 %v931_v47, %v2544_v40  ;;  %v2769_v18 = vadd.f32 %v930_v26, %v2550_v1 }
 0x19e   : > { %v1072_v7 = vsel %vm3081_vm11, %v1045_v42, inf  ;;  %v1071_v15 = vmin.f32 %v1063_v33, %v1070_v11  ;;  %v2748_v33 = vadd.f32 %v2618_v24, %v2530_v39  ;;  %v929_v59 = vsel %vm3085_vm12, %v2538_v30, 0.0 }
 0x19f   : > { %v1073_v41 = vmin.f32 %v1065_v49, %v1072_v7  ;;  %v1074_v17 = vmin.f32 %v1067_v20, %v1069_v37  ;;  %1553 = vrsqrt.f32 %v1100_v21  ;;  %v2779_v24 = vadd.f32 %v929_v59, %v745_v38  ;;  %v3090_v38 = vld [vmem:[#allocation7_spill] sm:$0xff] }
 0x1a0   : > { %v744_v40 = vsel %vm3087_vm4, %v2478_v6, 0.0  ;;  %v928_v1 = vsel %vm3088_vm13, %v2538_v30, 0.0  ;;  %vm1108_vm14 = vcmp.eq.f32.partialorder %v1100_v21, inf  ;;  %v1111_v22 = vand.u32 2147483648, %v1100_v21 }
 0x1a1   : > { %v1075_v25 = vmin.f32 %v1071_v15, %v1073_v41  ;;  %v2789_v23 = vadd.f32 %v928_v1, %v744_v40  ;;  %vm1110_vm1 = vcmp.eq.f32.partialorder %v1100_v21, 0.0  ;;  %v960_v37 = vadd.f32 %v2538_v30, %v2478_v6  ;;  %v3091_v1 = vld [vmem:[#allocation5_spill] sm:$0xff] }
 0x1a3   : > { %v1076_v39 = vmin.f32 %v1074_v17, %v1075_v25 }
 0x1a5   : > { %v1554_v5 = vpop.eup %1553  ;;  %v1077_v42 = vrot.slane %v1076_v39, 4 }
 0x1a6   : > { %v1102_v27 = vmul.f32 %v1554_v5, %v1100_v21 }
 0x1a7   : > { %v1078_v36 = vmin.f32 %v1076_v39, %v1077_v42  ;;  %v3089_v39 = vld [vmem:[#allocation6_spill] sm:$0xff]  ;;  %v3096_v42 = vld [vmem:[#allocation9_spill] sm:$0xff] }
 0x1a8   : > { %v1103_v51 = vmul.f32 %v1554_v5, %v1102_v27 }
 0x1a9   : > { %v1079_v16 = vrot.slane %v1078_v36, 2 }
 0x1aa   : > { %v1104_v19 = vmul.f32 0.5, %v1103_v51 }
 0x1ab   : > { %v1080_v14 = vmin.f32 %v1078_v36, %v1079_v16 }
 0x1ac   : > { %v1105_v28 = vsub.f32 1.5, %v1104_v19  ;;  %v3097_v19 = vld [vmem:[#allocation10_spill] sm:$0xff] }
 0x1ad   : > { %v1081_v49 = vrot.slane %v1080_v14, 1 }
 0x1ae   : > { %v1106_v9 = vmul.f32 %v1554_v5, %v1105_v28 }
 0x1af   : > { %v1082_v4 = vmin.f32 %v1080_v14, %v1081_v49 }
 0x1b0   : > { %v1107_v0 = vmul.f32 %v1106_v9, %v1100_v21 }
 0x1b1   : > { %vm1098_vm15 = vcmp.eq.f32.partialorder %v1890_v63, %v1082_v4  ;;  %vm1097_vm9 = vcmp.eq.f32.partialorder %v1888_v62, %v1082_v4  ;;  %vm1096_vm6 = vcmp.eq.f32.partialorder %v1886_v61, %v1082_v4  ;;  %vm1095_vm3 = vcmp.eq.f32.partialorder %v1884_v60, %v1082_v4 }
 0x1b2   : > { %v1109_v2 = vsel %vm1108_vm14, %v1100_v21, %v1107_v0  ;;  %vm1091_vm2 = vcmp.eq.f32.partialorder %v1874_v55, %v1082_v4  ;;  %vm1090_vm7 = vcmp.eq.f32.partialorder %v1872_v54, %v1082_v4  ;;  %vm1089_vm4 = vcmp.eq.f32.partialorder %v1870_v53, %v1082_v4 }
 0x1b3   : > { %v1112_v35 = vsel %vm1110_vm1, %v1111_v22, %v1109_v2  ;;  %vm1088_vm13 = vcmp.eq.f32.partialorder %v1868_v52, %v1082_v4  ;;  %vm1087_vm1 = vcmp.eq.f32.partialorder %v1866_v50, %v1082_v4  ;;  %vm1086_vm11 = vcmp.eq.f32.partialorder %v1864_v48, %v1082_v4 }
 0x1b4   : > { %v1113_v10 = vadd.f32 1e-08, %v1112_v35  ;;  %vm1085_vm5 = vcmp.eq.f32.partialorder %v1862_v46, %v1082_v4  ;;  %vm1084_vm8 = vcmp.eq.f32.partialorder %v1860_v45, %v1082_v4  ;;  %v1199_v45 = vld [vmem:[%s413_s28] sm:$0xf]  ;;  %v1639_v22 = vmov 0  }
 0x1b5   : > { %v1202_v46 = vld [vmem:[%s2938_s5] sm:$0xff]  ;;  %1543 = vset.pattern.permute.xlu0 %v1639_v22  ;;  %1544 = vset.pattern.permute.xlu1 %v1639_v22 }
 0x1b6   : > { %1555 = vrcp.f32 %v1113_v10  ;;  %v1125_v20 = vand.u32 2147483648, %v1113_v10  ;;  %v1123_v41 = vand.u32 2147483647, %v1113_v10  ;;  %vm1119_vm10 = vweird.f32 %v1113_v10  ;;  %v1270_v35 = vld [vmem:[%s2939_s6] sm:$0xff] }
 0x1b8   : > { %v1126_v6 = vor.u32 1.1754944e-38, %v1125_v20  ;;  %vm1124_vm14 = vcmp.eq.f32.partialorder %v1123_v41, 8.507059e+37  ;;  %v1201_v41 = vld [vmem:[%s2937_s4 + $0x8] sm:$0xff] }
 0x1bc   : > { %v1556_v3 = vpop.eup %1555 }
 0x1bd   : > { %v1115_v11 = vmul.f32 %v1556_v3, %v1113_v10  ;;  %vm1120_vm0 = vweird.f32 %v1556_v3 }
 0x1be   : > { %vm1121_vm12 = vmor %vm1119_vm10, %vm1120_vm0  ;;  %vm1083_vm0 = vcmp.eq.f32.partialorder %v1858_v44, %v1082_v4  ;;  %vm3092_vm10 = vcmp.eq.f32.partialorder %v1880_v58, %v1082_v4  ;;  %v1177_v44 = vld [vmem:[%s417_s25] sm:$0xf]  ;;  %s1481_s25 = sshll.u32 %s1629_s12, 3 }
 0x1bf   : > { %v1116_v7 = vsub.f32 1.0, %v1115_v11  ;;  %s1330_s28 = scalar_lea.hbm %s2942_s9, %s1481_s25 }
 0x1c0   : > { %s1334_s23 = sshll.u32 %s1330_s28, 4  ;;  %s1335_s23 = int_to_ptr.hbm [resolvable:$true] %s1334_s23 }
 0x1c1   : > { %v1117_v15 = vmul.f32 %v1556_v3, %v1116_v7  ;;  %s1573_s20 = sshra.s32 %s1335_s23, 4  ;;  %s1574_s20 = int_to_ptr.hbm [resolvable:$true] %s1573_s20 }
 0x1c2   : > { %s1575_s12 = scalar_lea.hbm %s1574_s20, 8  ;;  %p1580_p1 = scmp.lt.s32.totalorder %s1574_s20, %s2942_s9 }
 0x1c3   : > { %v1118_v29 = vadd.f32 %v1556_v3, %v1117_v15  ;;  %v1200_v15 = vld [vmem:[%s2937_s4] sm:$0xff]  ;;  %p1576_p12 = scmp.ne.s32.totalorder %s1574_s20, %s1575_s12  ;;  %p1581_p2 = scmp.lt.s32.totalorder %s1579_s18, %s1575_s12 }
 0x1c5   : > { %v1122_v30 = vsel %vm1121_vm12, %v1556_v3, %v1118_v29  ;;  %v1287_v29 = vld [vmem:[%s2941_s8] sm:$0xff]  ;;  %vm3098_vm12 = vcmask 130048   ;;  %p1577_p13 = pnand %p1576_p12, %p1730_p4  ;;  %p1582_p3 = por %p1581_p2, %p1580_p1 }
 0x1c6   : > { %v1127_v17 = vsel %vm1124_vm14, %v1126_v6, %v1122_v30  ;;  %1290 = vperm.xlu1 %1544, %v1287_v29  }
 0x1c7   : > { %v1144_v25 = vsel %vm1098_vm15, %v1127_v17, 0.0  ;;  %v1143_v12 = vsel %vm1097_vm9, %v1127_v17, 0.0  ;;  %v1142_v21 = vsel %vm1096_vm6, %v1127_v17, 0.0  ;;  %v1141_v47 = vsel %vm1095_vm3, %v1127_v17, 0.0  ;;  %p1578_p0 = pneg %p1577_p13 }
 0x1c8   : > { %v1160_v26 = vadd.f32 %v1144_v25, %v2568_v31  ;;  %v1159_v59 = vadd.f32 %v1143_v12, %v3089_v39  ;;  %v1158_v40 = vadd.f32 %v1142_v21, %v3090_v38  ;;  %v1157_v5 = vadd.f32 %v1141_v47, %v3091_v1  ;;  %v3095_v31 = vld [vmem:[#allocation8_spill] sm:$0xff]  ;;  %v1286_v1 = vld [vmem:[%s2940_s7] sm:$0xff] }
 0x1c9   : > { %v1140_v63 = vsel %vm3092_vm10, %v1127_v17, 0.0  ;;  %vm3093_vm15 = vcmp.eq.f32.partialorder %v1878_v57, %v1082_v4  ;;  %vm3094_vm9 = vcmp.eq.f32.partialorder %v1876_v56, %v1082_v4  ;;  %v1137_v60 = vsel %vm1091_vm2, %v1127_v17, 0.0  ;;  %p1583_p5 = pnand %p1582_p3, %p1578_p0 }
 0x1ca   : > { %v1139_v62 = vsel %vm3093_vm15, %v1127_v17, 0.0  ;;  %v1138_v61 = vsel %vm3094_vm9, %v1127_v17, 0.0  ;;  %1178 = vmatpush.msra.mxu1 %v1160_v26  ;;  %v1156_v27 = vadd.f32 %v1140_v63, %v3095_v31  ;;  %v1153_v28 = vadd.f32 %v1137_v60, %v2736_v34 }
 0x1cb   : > { %v1155_v51 = vadd.f32 %v1139_v62, %v3096_v42  ;;  %v1154_v36 = vadd.f32 %v1138_v61, %v3097_v19  ;;  %v1136_v58 = vsel %vm1090_vm7, %v1127_v17, 0.0  ;;  %v1135_v57 = vsel %vm1089_vm4, %v1127_v17, 0.0  ;;  %vm3099_vm7 = vmmov %vm3098_vm12 }
 0x1cc   : > { %v1134_v56 = vsel %vm1088_vm13, %v1127_v17, 0.0  ;;  %v1133_v55 = vsel %vm1087_vm1, %v1127_v17, 0.0  ;;  %1179 = vmatpush.msra.mxu1 %v1159_v59  ;;  %v1152_v9 = vadd.f32 %v1136_v58, %v2740_v32  ;;  %v1151_v16 = vadd.f32 %v1135_v57, %v2744_v13 }
 0x1cd   : > { %v1150_v0 = vadd.f32 %v1134_v56, %v2748_v33  ;;  %v1149_v34 = vadd.f32 %v1133_v55, %v2755_v8  ;;  %v1132_v54 = vsel %vm1086_vm11, %v1127_v17, 0.0  ;;  %v1131_v53 = vsel %vm1085_vm5, %v1127_v17, 0.0 }
 0x1ce   : > { %v1130_v52 = vsel %vm1084_vm8, %v1127_v17, 0.0  ;;  %v1129_v50 = vsel %vm1083_vm0, %v1127_v17, 0.0  ;;  %1180 = vmatpush.msra.mxu1 %v1158_v40  ;;  %v1148_v32 = vadd.f32 %v1132_v54, %v2766_v43  ;;  %v1147_v13 = vadd.f32 %v1131_v53, %v2769_v18  ;;  %v1203_v18 = vld [vmem:[%s2938_s5 + $0x8] sm:$0xff] }
 0x1cf   : > { %v1146_v33 = vadd.f32 %v1130_v52, %v2779_v24  ;;  %v1145_v48 = vadd.f32 %v1129_v50, %v2789_v23  ;;  %v1161_v8 = vadd.f32 %v1127_v17, %v960_v37  ;;  %vm1211_vm6 = vcmask 1043456   ;;  %v1271_v24 = vld [vmem:[%s2939_s6 + $0x8] sm:$0xff] }
 0x1d0   : > { %1181 = vmatpush.msra.mxu1 %v1157_v5  ;;  %vm1204_vm3 = vcmask 31744   ;;  %1473 = vmatpush.msk.msrb.mxu2 %vm1211_vm6, %v1199_v45 }
 0x1d1   : > { %1557 = vrcp.f32 %v1161_v8  ;;  %1474 = vmatmul.msk.f32.vlgmr.msrb.gmra.mxu2 %vm1204_vm3, %v1202_v46  ;;  %1279 = vperm.xlu0 %1543, %v1271_v24   ;;  %v1173_v49 = vand.u32 2147483648, %v1161_v8  ;;  %vm1167_vm11 = vweird.f32 %v1161_v8  ;;  %v1171_v3 = vand.u32 2147483647, %v1161_v8 }
 0x1d2   : > { %1182 = vmatpush.msra.mxu1 %v1156_v27 }
 0x1d3   : > { %v1174_v11 = vor.u32 1.1754944e-38, %v1173_v49  ;;  %vm1172_vm2 = vcmp.eq.f32.partialorder %v1171_v3, 8.507059e+37 }
 0x1d4   : > { %1183 = vmatpush.msra.mxu1 %v1155_v51 }
 0x1d6   : > { %1184 = vmatpush.msra.mxu1 %v1154_v36 }
 0x1d7   : > { %v1558_v43 = vpop.eup %1557 }
 0x1d8   : > { %1185 = vmatpush.msra.mxu1 %v1153_v28  ;;  %v1163_v23 = vmul.f32 %v1558_v43, %v1161_v8  ;;  %vm1168_vm5 = vweird.f32 %v1558_v43 }
 0x1d9   : > { %1475 = vmatmul.msk.f32.gmra.mxu2 %vm1204_vm3, %v1203_v18  ;;  %1274 = vperm.xlu0 %1543, %v1270_v35   ;;  %vm1169_vm8 = vmor %vm1167_vm11, %vm1168_vm5 }
 0x1da   : > { %1186 = vmatpush.msra.mxu1 %v1152_v9  ;;  %v1164_v2 = vsub.f32 1.0, %v1163_v23 }
 0x1dc   : > { %1187 = vmatpush.msra.mxu1 %v1151_v16  ;;  %v1165_v14 = vmul.f32 %v1558_v43, %v1164_v2 }
 0x1de   : > { %1188 = vmatpush.msra.mxu1 %v1150_v0  ;;  %v1166_v10 = vadd.f32 %v1558_v43, %v1165_v14 }
 0x1e0   : > { %1189 = vmatpush.msra.mxu1 %v1149_v34  ;;  %v1170_v4 = vsel %vm1169_vm8, %v1558_v43, %v1166_v10 }
 0x1e1   : > { %v1175_v7 = vsel %vm1172_vm2, %v1174_v11, %v1170_v4 }
 0x1e2   : > { %1190 = vmatpush.msra.mxu1 %v1148_v32 }
 0x1e4   : > { %1191 = vmatpush.msra.mxu1 %v1147_v13 }
 0x1e6   : > { %1192 = vmatpush.msra.mxu1 %v1146_v33 }
 0x1e8   : > { %1193 = vmatpush.msra.mxu1 %v1145_v48 }
 0x1e9   : > { %1194 = vmatmul.f32.vlgmr.msra.gmra.mxu1 %v1177_v44 }
 0x238   : > { %v1291_v5 = vpop.permute.xlu1 %1290 }
 0x243   : > { %v1280_v30 = vpop.permute.xlu0 %1279 }
 0x24b   : > { %v1275_v47 = vpop.permute.xlu0 %1274 }
 0x254   : > { %v1232_v6 = vpop.f32.mrf.mxu2 }
 0x25c   : > { %v1235_v25 = vpop.f32.mrf.mxu2 }
 0x266   : > { %v1195_v20 = vpop.f32.mrf.mxu1 }
 0x267   : > { %v1198_v37 = vmul.f32 %v1195_v20, %v1175_v7 }
 0x269   : > { %1476 = vmatpush.msk.msrb.mxu3 %vm1211_vm6, %v1198_v37 }
 0x26a   : > { %1477 = vmatmul.msk.f32.vlgmr.msrb.gmra.mxu3 %vm1204_vm3, %v1200_v15 }
 0x272   : > { %1478 = vmatmul.msk.f32.gmra.mxu3 %vm1204_vm3, %v1201_v41 }
 0x2ed   : > { %v1264_v17 = vpop.f32.mrf.mxu3 }
 0x2ee   : > { %v1265_v12 = vadd.f32 %v1264_v17, %v1232_v6 }
 0x2f0   : > { %v1282_v59 = vadd.f32 %v1275_v47, %v1265_v12 }
 0x2f2   : > { %v1284_v40 = vmax.f32 %v1282_v59, 0.0 }
 0x2f5   : > { %v1267_v21 = vpop.f32.mrf.mxu3 }
 0x2f6   : > { %v1268_v26 = vadd.f32 %v1267_v21, %v1235_v25 }
 0x2f8   : > { %v1283_v39 = vadd.f32 %v1280_v30, %v1268_v26 }
 0x2fa   : > { %v1285_v38 = vmax.f32 %v1283_v39, 0.0 }
 0x2fc   : > { %1310 = vmatpush.msra.mxu2 %v1285_v38 }
 0x2fe   : > { %1311 = vmatpush.msra.mxu2 %v1284_v40 }
 0x2ff   : > { %1479 = vmatmul.msk.f32.vlgmr.msra.gmra.mxu2 %vm3098_vm12, %v1286_v1 }
 0x382   : > { %v1313_v63 = vpop.f32.mrf.mxu2 }
 0x383   : > { %v1314_v62 = vadd.f32 %v1313_v63, %v1291_v5 }
 0x385   : > { %v1316_v61 = vmax.f32 %v1314_v62, 0.0 }
 0x387   : > { %1317 = vst.msk [vmem:[%s394_s29] sm:$0xff] %vm3099_vm7, %v1316_v61 }
 0x388   : > { %1586 = shalt.err (!%p1583_p5)
}
 0x389   : > { %1487 = dma.vmem_to_hbm [thread:$0]  (%p1730_p4), %s1333_s15, 128, %s1335_s23, %s1319_s16  }
 0x38a PF: > { %p1493_p6 = scmp.ge.s32.totalorder %s1637_s14, 2  ;;  %s1346_s24 = sand.u32 1, %s1617_s30  }
 0x38b   : > { %s1347_s29 = scalar_lea.sflag [#allocation3], %s1346_s24 }
 0x38c   : > { %p1490_p7 = pnand %p1493_p6, %p1737_p8 }
 0x38e   : > { %p1491_p9 = pneg %p1490_p7 }
 0x390   : > { %1612 = dma.done.wait (%p1491_p9), %s1347_s29, 128  }
 0x391   : > { %1614 = vsyncadd (%p1491_p9), %s1347_s29, 4294967168  ;;  %s22_s14 = sadd.s32 1, %s1637_s14   ;;  %s3100_s30 = smov %s1621_s10 }
 0x392   : > { %p19_p10 = scmp.ge.s32.totalorder %s22_s14, 4   ;;  %s3101_s10 = smov %s1625_s11 }
 0x393   : > { %s3102_s11 = smov %s1743_s22  ;;  %s3103_s12 = smov %s1633_s13 }
 0x394   : > { %s3104_s13 = smov %s3106_s17  ;;  %21 = sbr.rel (!%p19_p10) target bundleno = 4 (0x4), region = 100 }
 0x399   :  { %1353 = vsyncpa [#allocation3], 1 }
 0x39a   :  { %1355 = vsyncpa [#allocation3 + $0x1], 1 }

</bundles_post_ra>
